<compile_context>
chip_gen: v5e
topology: v5e:2x2
jax: 0.10.0
libtpu: 0.0.40
codegen_flags: <defaults>
</compile_context>

<pallas_src>
import jax
import jax.numpy as jnp
from jax import lax
from jax.experimental import pallas as pl
from jax.experimental.pallas import tpu as pltpu


def _round_up(a, m):
    return -(-a // m) * m


# ---------------- constant-matrix constructors (wrapper-side, run once) ----------------

def conv1d_as_matmul(w, in_len):
    """Dense matrix M so that y_flat = x_flat @ M reproduces Conv1d (valid, stride 1).

    w: (Cout, Cin, K) PyTorch-layout conv weight.
    x_flat layout: ci*in_len + l ; y_flat layout: co*out_len + t.
    Returns (Cin*in_len, Cout*out_len).
    """
    c_out, c_in, k = w.shape
    out_len = in_len - k + 1
    l_idx = jnp.arange(in_len)
    t_idx = jnp.arange(out_len)
    tap = l_idx[:, None] - t_idx[None, :]                       # (L, T)
    valid = ((tap >= 0) & (tap < k)).astype(w.dtype)
    tap_c = jnp.clip(tap, 0, k - 1)
    m = w[:, :, tap_c] * valid[None, None, :, :]                # (Cout, Cin, L, T)
    return jnp.transpose(m, (1, 2, 0, 3)).reshape(c_in * in_len, c_out * out_len)


def fold_pool(m, c_out, out_len):
    """Reorder conv-matrix columns (layout co*out_len + t) into [even | odd] pooled
    order so that MaxPool1d(2,2) becomes max() of the two static column halves.
    Returns (K, 2 * c_out * (out_len // 2)); each half is laid out co*(out_len//2)+t'."""
    pooled = out_len // 2
    co = jnp.arange(c_out)
    tp = jnp.arange(pooled)
    even_cols = (co[:, None] * out_len + 2 * tp[None, :]).reshape(-1)
    odd_cols = even_cols + 1
    return jnp.concatenate([m[:, even_cols], m[:, odd_cols]], axis=1)


def _pad_halves(m, real_half, half):
    """Place the two real_half-wide column halves of m at lane offsets 0 and `half`
    (zero-padding between / after), so both jnp.maximum operands are vreg-aligned."""
    if half == real_half:
        return m
    out = jnp.zeros((m.shape[0], 2 * half), m.dtype)
    out = out.at[:, :real_half].set(m[:, :real_half])
    out = out.at[:, half:half + real_half].set(m[:, real_half:])
    return out


def prepare_constants(params, lane_pad):
    """Build the folded conv/pool matrices, pooled biases and padded fc3 weights.
    Matmul operands are bf16; biases stay f32 (elementwise path stays f32)."""
    w1, b1, w2, b2, w3, b3 = [jnp.asarray(p, jnp.float32) for p in params]

    half1 = 256 if lane_pad else 168   # pooled conv1 width (3 ch * 56), maybe lane-padded
    half2 = 256 if lane_pad else 126   # pooled conv2 width (6 ch * 21), maybe lane-padded

    m1 = fold_pool(conv1d_as_matmul(w1, 126), 3, 112)           # (1512, 336)
    m2 = fold_pool(conv1d_as_matmul(w2, 56), 6, 42)             # (168, 252)

    m1p = _pad_halves(m1, 168, half1)                           # (1512, 2*half1)
    m2p = _pad_halves(m2, 126, half2)                           # (168, 2*half2)
    # conv2 consumes the pooled layer-1 activation (width half1; cols >=168 are zero)
    m2p = jnp.zeros((half1, 2 * half2), jnp.float32).at[:168, :].set(m2p)
    # fc3: rows = pooled layer-2 activation (width half2), cols padded to 128 lanes
    w3p = jnp.zeros((half2, 128), jnp.float32).at[:126, :6].set(w3.T)

    b1p = jnp.zeros((1, half1), jnp.float32).at[0, :168].set(jnp.repeat(b1, 56))
    b2p = jnp.zeros((1, half2), jnp.float32).at[0, :126].set(jnp.repeat(b2, 21))
    b3p = jnp.zeros((1, 128), jnp.float32).at[0, :6].set(b3)

    return dict(m1=m1p.astype(jnp.bfloat16), b1=b1p,
                m2=m2p.astype(jnp.bfloat16), b2=b2p,
                w3=w3p.astype(jnp.bfloat16), b3=b3p,
                half1=half1, half2=half2)


# ------------------------------------ Pallas kernel ------------------------------------

def _make_kernel(half1, half2):
    def net_kernel(x_ref, m1_ref, b1_ref, m2_ref, b2_ref, w3_ref, b3_ref, o_ref):
        x = x_ref[...]                                           # (B, 1512) bf16

        # conv1 (+ folded maxpool): one bf16 MXU push, f32 accumulate
        h1 = jnp.dot(x, m1_ref[...], preferred_element_type=jnp.float32)
        # pool(relu(conv+b)) == relu(max(even, odd) + b)   (relu/+b monotone)
        p1 = jnp.maximum(
            jnp.maximum(h1[:, :half1], h1[:, half1:]) + b1_ref[...], 0.0)

        # conv2 (+ folded maxpool)
        h2 = jnp.dot(p1.astype(jnp.bfloat16), m2_ref[...],
                     preferred_element_type=jnp.float32)
        p2 = jnp.maximum(
            jnp.maximum(h2[:, :half2], h2[:, half2:]) + b2_ref[...], 0.0)
        # p2[:, :126] is exactly PyTorch's view(-1, 6*21) order

        # fc3, output padded to 128 lanes for a dense (unmasked) store
        o_ref[...] = (jnp.dot(p2.astype(jnp.bfloat16), w3_ref[...],
                              preferred_element_type=jnp.float32)
                      + b3_ref[...]).astype(o_ref.dtype)
    return net_kernel


# -------------------------------------- Wrapper ----------------------------------------

def _use_lane_padded_halves():
    """Lane-pad the even/odd halves only on 256-wide-MXU chips (v6e / v7x)."""
    try:
        kind = jax.devices()[0].device_kind.lower()
    except Exception:
        return False
    return ("v6" in kind) or ("v7" in kind)


def _pick_b_tile(n):
    """Batch tile (multiple of 16 for bf16 sublane packing).  Ensure >=2 grid
    steps whenever the batch allows it, so v7x's two TensorCores both get work."""
    if n >= 512:
        return 256
    if n >= 32:
        return _round_up(_round_up(n, 2) // 2, 16)
    return _round_up(max(n, 1), 16)


def make_net(params, b_tile=None):
    """Build constants once per parameter set; return a jitted forward(x)->(N,6)."""
    lane_pad = _use_lane_padded_halves()
    consts = prepare_constants(params, lane_pad)
    half1, half2 = consts["half1"], consts["half2"]
    kernel = _make_kernel(half1, half2)
    const2d = lambda i: (0, 0)

    @jax.jit
    def forward(x, m1, b1, m2, b2, w3, b3):
        n = x.shape[0]
        bt = b_tile if b_tile is not None else _pick_b_tile(n)
        n_pad = _round_up(n, bt)

        # Channel-major flatten (ci*126 + l), ship as bf16 (halves the input DMA).
        x_flat = x.reshape(n, 12 * 126).astype(jnp.bfloat16)
        if n_pad != n:
            x_flat = jnp.pad(x_flat, ((0, n_pad - n), (0, 0)))

        out_pad = pl.pallas_call(
            kernel,
            out_shape=jax.ShapeDtypeStruct((n_pad, 128), jnp.float32),
            grid=(n_pad // bt,),
            in_specs=[
                pl.BlockSpec((bt, 12 * 126), lambda i: (i, 0)),
                pl.BlockSpec((12 * 126, 2 * half1), const2d),
                pl.BlockSpec((1, half1), const2d),
                pl.BlockSpec((half1, 2 * half2), const2d),
                pl.BlockSpec((1, half2), const2d),
                pl.BlockSpec((half2, 128), const2d),
                pl.BlockSpec((1, 128), const2d),
            ],
            out_specs=pl.BlockSpec((bt, 128), lambda i: (i, 0)),
            compiler_params=pltpu.CompilerParams(
                dimension_semantics=("parallel",)),
        )(x_flat, m1, b1, m2, b2, w3, b3)

        return out_pad[:n, :6]

    def net_forward(x):
        return forward(x, consts["m1"], consts["b1"], consts["m2"], consts["b2"],
                       consts["w3"], consts["b3"])

    return net_forward


# ------------------------------ Reference (pure JAX) ------------------------------------

def net_reference(x, params):
    w1, b1, w2, b2, w3, b3 = params
    dn = ("NCH", "OIH", "NCH")
    y = lax.conv_general_dilated(x, w1, (1,), "VALID", dimension_numbers=dn)
    y = jnp.maximum(y + b1[None, :, None], 0.0)
    y = lax.reduce_window(y, -jnp.inf, lax.max, (1, 1, 2), (1, 1, 2), "VALID")
    y = lax.conv_general_dilated(y, w2, (1,), "VALID", dimension_numbers=dn)
    y = jnp.maximum(y + b2[None, :, None], 0.0)
    y = lax.reduce_window(y, -jnp.inf, lax.max, (1, 1, 2), (1, 1, 2), "VALID")
    y = y.reshape(y.shape[0], -1)                               # (N, 6*21)
    return y @ w3.T + b3


# ------------------------------ Param init (deterministic) ------------------------------

def init_params(key):
    ks = jax.random.split(key, 6)

    def u(k, shape, fan_in):
        bound = 1.0 / jnp.sqrt(jnp.float32(fan_in))
        return jax.random.uniform(k, shape, jnp.float32, -bound, bound)

    w1 = u(ks[0], (3, 12, 15), 12 * 15)   # Conv1d(12, 3, 15)
    b1 = u(ks[1], (3,), 12 * 15)
    w2 = u(ks[2], (6, 3, 15), 3 * 15)     # Conv1d(3, 6, 15)
    b2 = u(ks[3], (6,), 3 * 15)
    w3 = u(ks[4], (6, 126), 126)          # Linear(126, 6)
    b3 = u(ks[5], (6,), 126)
    return w1, b1, w2, b2, w3, b3


# ----------------------------------------- Main -----------------------------------------

if __name__ == "__main__":
    key = jax.random.PRNGKey(0)
    kp, kx = jax.random.split(key)
    params = init_params(kp)

    # input: (batch=2, channels=12, length=126) — the only length compatible
    # with the module's hard-coded 6*21 flatten.
    x = jax.random.normal(kx, (2, 12, 126), jnp.float32)

    net = make_net(params)
    out = jax.block_until_ready(net(x))
    ref = jax.block_until_ready(net_reference(x, params))

    assert out.shape == (2, 6)
    # bf16 MXU operands with f32 accumulation: tolerance relaxed vs. the f32 path.
    assert jnp.allclose(out, ref, atol=2e-2, rtol=2e-2), (out, ref)

    print("KERNEL_OK")
</pallas_src>

<mosaic_0001>
module attributes {stable_mosaic.version = 11 : i64} {
  func.func @net_kernel(%arg0: i32, %arg1: memref<16x1512xbf16, #tpu.memory_space<vmem>>, %arg2: memref<1512x336xbf16, #tpu.memory_space<vmem>>, %arg3: memref<1x168xf32, #tpu.memory_space<vmem>>, %arg4: memref<168x252xbf16, #tpu.memory_space<vmem>>, %arg5: memref<1x126xf32, #tpu.memory_space<vmem>>, %arg6: memref<126x128xbf16, #tpu.memory_space<vmem>>, %arg7: memref<1x128xf32, #tpu.memory_space<vmem>>, %arg8: memref<16x128xf32, #tpu.memory_space<vmem>>) attributes {dimension_semantics = [#tpu.dimension_semantics<parallel>], iteration_bounds = array<i64: 1>, scalar_prefetch = 0 : i64, scratch_operands = 0 : i64, tpu.core_type = #tpu.core_type<tc>, window_params = [{transform_indices = @transform_0, window_bounds = array<i64: 16, 1512>}, {pipeline_mode = #tpu.pipeline_mode<synchronous>, transform_indices = @transform_1, window_bounds = array<i64: 1512, 336>}, {pipeline_mode = #tpu.pipeline_mode<synchronous>, transform_indices = @transform_2, window_bounds = array<i64: 1, 168>}, {pipeline_mode = #tpu.pipeline_mode<synchronous>, transform_indices = @transform_3, window_bounds = array<i64: 168, 252>}, {pipeline_mode = #tpu.pipeline_mode<synchronous>, transform_indices = @transform_4, window_bounds = array<i64: 1, 126>}, {pipeline_mode = #tpu.pipeline_mode<synchronous>, transform_indices = @transform_5, window_bounds = array<i64: 126, 128>}, {pipeline_mode = #tpu.pipeline_mode<synchronous>, transform_indices = @transform_6, window_bounds = array<i64: 1, 128>}, {transform_indices = @transform_7, window_bounds = array<i64: 16, 128>}]} {
    %c0 = arith.constant 0 : index
    %c0_0 = arith.constant 0 : index
    %0 = vector.load %arg1[%c0, %c0_0] : memref<16x1512xbf16, #tpu.memory_space<vmem>>, vector<16x1512xbf16>
    %c0_1 = arith.constant 0 : index
    %c0_2 = arith.constant 0 : index
    %1 = vector.load %arg2[%c0_1, %c0_2] : memref<1512x336xbf16, #tpu.memory_space<vmem>>, vector<1512x336xbf16>
    %cst = arith.constant dense<0.000000e+00> : vector<16x336xf32>
    %2 = tpu.matmul %0, %1, %cst {dimension_numbers = #tpu.dot_dimension_numbers<[1], [0], [0], [1], [0, 0, 1, 1], [], []>} : vector<16x1512xbf16>, vector<1512x336xbf16>, vector<16x336xf32> -> vector<16x336xf32>
    %3 = vector.extract_strided_slice %2 {offsets = [0, 0], sizes = [16, 168], strides = [1, 1]} : vector<16x336xf32> to vector<16x168xf32>
    %4 = vector.extract_strided_slice %2 {offsets = [0, 168], sizes = [16, 168], strides = [1, 1]} : vector<16x336xf32> to vector<16x168xf32>
    %5 = arith.maximumf %3, %4 : vector<16x168xf32>
    %c0_3 = arith.constant 0 : index
    %c0_4 = arith.constant 0 : index
    %6 = vector.load %arg3[%c0_3, %c0_4] : memref<1x168xf32, #tpu.memory_space<vmem>>, vector<1x168xf32>
    %7 = vector.broadcast %6 : vector<1x168xf32> to vector<16x168xf32>
    %8 = arith.addf %5, %7 : vector<16x168xf32>
    %cst_5 = arith.constant 0.000000e+00 : f32
    %9 = vector.broadcast %cst_5 : f32 to vector<16x168xf32>
    %10 = arith.maximumf %8, %9 : vector<16x168xf32>
    %11 = arith.truncf %10 : vector<16x168xf32> to vector<16x168xbf16>
    %c0_6 = arith.constant 0 : index
    %c0_7 = arith.constant 0 : index
    %12 = vector.load %arg4[%c0_6, %c0_7] : memref<168x252xbf16, #tpu.memory_space<vmem>>, vector<168x252xbf16>
    %cst_8 = arith.constant dense<0.000000e+00> : vector<16x252xf32>
    %13 = tpu.matmul %11, %12, %cst_8 {dimension_numbers = #tpu.dot_dimension_numbers<[1], [0], [0], [1], [0, 0, 1, 1], [], []>} : vector<16x168xbf16>, vector<168x252xbf16>, vector<16x252xf32> -> vector<16x252xf32>
    %14 = vector.extract_strided_slice %13 {offsets = [0, 0], sizes = [16, 126], strides = [1, 1]} : vector<16x252xf32> to vector<16x126xf32>
    %15 = vector.extract_strided_slice %13 {offsets = [0, 126], sizes = [16, 126], strides = [1, 1]} : vector<16x252xf32> to vector<16x126xf32>
    %16 = arith.maximumf %14, %15 : vector<16x126xf32>
    %c0_9 = arith.constant 0 : index
    %c0_10 = arith.constant 0 : index
    %17 = vector.load %arg5[%c0_9, %c0_10] : memref<1x126xf32, #tpu.memory_space<vmem>>, vector<1x126xf32>
    %18 = vector.broadcast %17 : vector<1x126xf32> to vector<16x126xf32>
    %19 = arith.addf %16, %18 : vector<16x126xf32>
    %cst_11 = arith.constant 0.000000e+00 : f32
    %20 = vector.broadcast %cst_11 : f32 to vector<16x126xf32>
    %21 = arith.maximumf %19, %20 : vector<16x126xf32>
    %22 = arith.truncf %21 : vector<16x126xf32> to vector<16x126xbf16>
    %c0_12 = arith.constant 0 : index
    %c0_13 = arith.constant 0 : index
    %23 = vector.load %arg6[%c0_12, %c0_13] : memref<126x128xbf16, #tpu.memory_space<vmem>>, vector<126x128xbf16>
    %cst_14 = arith.constant dense<0.000000e+00> : vector<16x128xf32>
    %24 = tpu.matmul %22, %23, %cst_14 {dimension_numbers = #tpu.dot_dimension_numbers<[1], [0], [0], [1], [0, 0, 1, 1], [], []>} : vector<16x126xbf16>, vector<126x128xbf16>, vector<16x128xf32> -> vector<16x128xf32>
    %c0_15 = arith.constant 0 : index
    %c0_16 = arith.constant 0 : index
    %25 = vector.load %arg7[%c0_15, %c0_16] : memref<1x128xf32, #tpu.memory_space<vmem>>, vector<1x128xf32>
    %26 = vector.broadcast %25 : vector<1x128xf32> to vector<16x128xf32>
    %27 = arith.addf %24, %26 : vector<16x128xf32>
    %c0_17 = arith.constant 0 : index
    %c0_18 = arith.constant 0 : index
    %28 = vector.load %arg8[%c0_17, %c0_18] : memref<16x128xf32, #tpu.memory_space<vmem>>, vector<16x128xf32>
    tpu.vector_store %arg8[%c0_17, %c0_18], %27 {strides = array<i32>} : memref<16x128xf32, #tpu.memory_space<vmem>>, vector<16x128xf32>,
    return
  }
  func.func @transform_0(%arg0: i32) -> (i32, i32) {
    %c0_i32 = arith.constant 0 : i32
    %c0_i32_0 = arith.constant 0 : i32
    return %arg0, %c0_i32 : i32, i32
  }
  func.func @transform_1(%arg0: i32) -> (i32, i32) {
    %c0_i32 = arith.constant 0 : i32
    %c0_i32_0 = arith.constant 0 : i32
    %c0_i32_1 = arith.constant 0 : i32
    return %c0_i32, %c0_i32_0 : i32, i32
  }
  func.func @transform_2(%arg0: i32) -> (i32, i32) {
    %c0_i32 = arith.constant 0 : i32
    %c0_i32_0 = arith.constant 0 : i32
    %c0_i32_1 = arith.constant 0 : i32
    return %c0_i32, %c0_i32_0 : i32, i32
  }
  func.func @transform_3(%arg0: i32) -> (i32, i32) {
    %c0_i32 = arith.constant 0 : i32
    %c0_i32_0 = arith.constant 0 : i32
    %c0_i32_1 = arith.constant 0 : i32
    return %c0_i32, %c0_i32_0 : i32, i32
  }
  func.func @transform_4(%arg0: i32) -> (i32, i32) {
    %c0_i32 = arith.constant 0 : i32
    %c0_i32_0 = arith.constant 0 : i32
    %c0_i32_1 = arith.constant 0 : i32
    return %c0_i32, %c0_i32_0 : i32, i32
  }
  func.func @transform_5(%arg0: i32) -> (i32, i32) {
    %c0_i32 = arith.constant 0 : i32
    %c0_i32_0 = arith.constant 0 : i32
    %c0_i32_1 = arith.constant 0 : i32
    return %c0_i32, %c0_i32_0 : i32, i32
  }
  func.func @transform_6(%arg0: i32) -> (i32, i32) {
    %c0_i32 = arith.constant 0 : i32
    %c0_i32_0 = arith.constant 0 : i32
    %c0_i32_1 = arith.constant 0 : i32
    return %c0_i32, %c0_i32_0 : i32, i32
  }
  func.func @transform_7(%arg0: i32) -> (i32, i32) {
    %c0_i32 = arith.constant 0 : i32
    %c0_i32_0 = arith.constant 0 : i32
    return %arg0, %c0_i32 : i32, i32
  }
}

</mosaic_0001>

<bundles_post_ra>
// kernel: forward.1
= control target key start
LH: loop header
LB: loop body
LE: loop exit
PB: predicated region body
PF: predicated region fallthrough
CT: control target
= control target key end

     0   :  { %vm1992_vm0 = vcmask 1043456   ;;  %vm1988_vm1 = vcmask 850944   ;;  %vm2518_vm2 = vcmask 719872   ;;  %vm2671_vm3 = vcmask 326656   ;;  %s6559_s1 = inlined_call_operand.vmem [shape: bf16[1512,336], index: 1, kind: input, shape index: {}]   ;;  %s6560_s0 = inlined_call_operand.vmem [shape: bf16[16,1512], index: 0, kind: input, shape index: {}]   ;;  %s6561_s3 = inlined_call_operand.vmem [shape: bf16[168,252], index: 3, kind: input, shape index: {}]   ;;  %s6562_s2 = inlined_call_operand.vmem [shape: f32[1,168], index: 2, kind: input, shape index: {}]   ;;  %s6563_s4 = inlined_call_operand.vmem [shape: f32[1,126], index: 4, kind: input, shape index: {}]   ;;  %s6564_s6 = inlined_call_operand.vmem [shape: f32[1,128], index: 6, kind: input, shape index: {}]   ;;  %s6565_s5 = inlined_call_operand.vmem [shape: bf16[126,128], index: 5, kind: input, shape index: {}]   ;;  %s6566_s7 = inlined_call_operand.vmem [shape: f32[16,128], index: 7, kind: output, shape index: {}]  }
   0x1   :  { %v2994_v0 = vld [vmem:[%s6559_s1 + $0xa8] sm:$0xf]  ;;  %v4188_v1 = vld [vmem:[%s6559_s1 + $0xb0] sm:$0xf0]  ;;  %v2982_v11 = vld [vmem:[%s6559_s1 + $0x90] sm:$0xf] }
   0x2   :  { %v3186_v2 = vld [vmem:[%s6559_s1 + $0x228] sm:$0xf]  ;;  %v2995_v3 = vor.u32 %v4188_v1, %v2994_v0  ;;  %v4236_v4 = vld [vmem:[%s6559_s1 + $0x230] sm:$0xf0]  ;;  %v4185_v13 = vld [vmem:[%s6559_s1 + $0x98] sm:$0xf0] }
   0x3   :  { %v3282_v5 = vld [vmem:[%s6559_s1 + $0x2e8] sm:$0xf]  ;;  %v4260_v6 = vld [vmem:[%s6559_s1 + $0x2f0] sm:$0xf0]  ;;  %v3187_v7 = vor.u32 %v4236_v4, %v3186_v2  ;;  %v3174_v14 = vld [vmem:[%s6559_s1 + $0x210] sm:$0xf]  ;;  %v2983_v16 = vor.u32 %v4185_v13, %v2982_v11 }
   0x4   :  { %v3283_v8 = vor.u32 %v4260_v6, %v3282_v5  ;;  %v3090_v9 = vld [vmem:[%s6559_s1 + $0x168] sm:$0xf]  ;;  %v4212_v10 = vld [vmem:[%s6559_s1 + $0x170] sm:$0xf0]  ;;  %2002 = vmatpush.bf16.msra.mxu0 %v2995_v3  ;;  %v4233_v15 = vld [vmem:[%s6559_s1 + $0x218] sm:$0xf0] }
   0x5   :  { %v3091_v12 = vor.u32 %v4212_v10, %v3090_v9  ;;  %2030 = vmatpush.bf16.msra.mxu2 %v3187_v7  ;;  %v3175_v17 = vor.u32 %v4233_v15, %v3174_v14  ;;  %v3270_v18 = vld [vmem:[%s6559_s1 + $0x2d0] sm:$0xf]  ;;  %v4257_v19 = vld [vmem:[%s6559_s1 + $0x2d8] sm:$0xf0]  ;;  %v2970_v23 = vld [vmem:[%s6559_s1 + $0x78] sm:$0xf] }
   0x6   :  { %2044 = vmatpush.bf16.msra.mxu3 %v3283_v8  ;;  %v3078_v20 = vld [vmem:[%s6559_s1 + $0x150] sm:$0xf]  ;;  %v3271_v21 = vor.u32 %v4257_v19, %v3270_v18  ;;  %v4209_v22 = vld [vmem:[%s6559_s1 + $0x158] sm:$0xf0]  ;;  %v4182_v24 = vld [vmem:[%s6559_s1 + $0x80] sm:$0xf0] }
   0x7   :  { %2016 = vmatpush.bf16.msra.mxu1 %v3091_v12  ;;  %v3079_v25 = vor.u32 %v4209_v22, %v3078_v20  ;;  %v3162_v26 = vld [vmem:[%s6559_s1 + $0x1f8] sm:$0xf]  ;;  %v4230_v27 = vld [vmem:[%s6559_s1 + $0x200] sm:$0xf0]  ;;  %v2971_v29 = vor.u32 %v4182_v24, %v2970_v23  ;;  %v2958_v35 = vld [vmem:[%s6559_s1 + $0x60] sm:$0xf] }
   0x8   :  { %v3258_v28 = vld [vmem:[%s6559_s1 + $0x2b8] sm:$0xf]  ;;  %2003 = vmatpush.bf16.msra.mxu0 %v2983_v16  ;;  %v4254_v30 = vld [vmem:[%s6559_s1 + $0x2c0] sm:$0xf0]  ;;  %v3163_v33 = vor.u32 %v4230_v27, %v3162_v26  ;;  %v4179_v36 = vld [vmem:[%s6559_s1 + $0x68] sm:$0xf0] }
   0x9   :  { %v3066_v31 = vld [vmem:[%s6559_s1 + $0x138] sm:$0xf]  ;;  %v4206_v32 = vld [vmem:[%s6559_s1 + $0x140] sm:$0xf0]  ;;  %2031 = vmatpush.bf16.msra.mxu2 %v3175_v17  ;;  %v3259_v34 = vor.u32 %v4254_v30, %v3258_v28  ;;  %v3150_v37 = vld [vmem:[%s6559_s1 + $0x1e0] sm:$0xf]  ;;  %v2959_v44 = vor.u32 %v4179_v36, %v2958_v35 }
   0xa   :  { %2045 = vmatpush.bf16.msra.mxu3 %v3271_v21  ;;  %v3067_v38 = vor.u32 %v4206_v32, %v3066_v31  ;;  %v4227_v39 = vld [vmem:[%s6559_s1 + $0x1e8] sm:$0xf0]  ;;  %v3246_v40 = vld [vmem:[%s6559_s1 + $0x2a0] sm:$0xf]  ;;  %v2946_v47 = vld [vmem:[%s6559_s1 + $0x48] sm:$0xf] }
   0xb   :  { %2017 = vmatpush.bf16.msra.mxu1 %v3079_v25  ;;  %v4251_v41 = vld [vmem:[%s6559_s1 + $0x2a8] sm:$0xf0]  ;;  %v3054_v42 = vld [vmem:[%s6559_s1 + $0x120] sm:$0xf]  ;;  %v3151_v45 = vor.u32 %v4227_v39, %v3150_v37  ;;  %v4176_v48 = vld [vmem:[%s6559_s1 + $0x50] sm:$0xf0] }
   0xc   :  { %v4203_v43 = vld [vmem:[%s6559_s1 + $0x128] sm:$0xf0]  ;;  %2004 = vmatpush.bf16.msra.mxu0 %v2971_v29  ;;  %v3247_v46 = vor.u32 %v4251_v41, %v3246_v40  ;;  %v3138_v49 = vld [vmem:[%s6559_s1 + $0x1c8] sm:$0xf]  ;;  %v4224_v51 = vld [vmem:[%s6559_s1 + $0x1d0] sm:$0xf0]  ;;  %v2947_v56 = vor.u32 %v4176_v48, %v2946_v47 }
   0xd   :  { %2032 = vmatpush.bf16.msra.mxu2 %v3163_v33  ;;  %v3055_v50 = vor.u32 %v4203_v43, %v3054_v42  ;;  %v3234_v52 = vld [vmem:[%s6559_s1 + $0x288] sm:$0xf]  ;;  %v4248_v53 = vld [vmem:[%s6559_s1 + $0x290] sm:$0xf0]  ;;  %v3139_v57 = vor.u32 %v4224_v51, %v3138_v49  ;;  %v2934_v59 = vld [vmem:[%s6559_s1 + $0x30] sm:$0xf] }
   0xe   :  { %2046 = vmatpush.bf16.msra.mxu3 %v3259_v34  ;;  %v3042_v54 = vld [vmem:[%s6559_s1 + $0x108] sm:$0xf]  ;;  %v4200_v55 = vld [vmem:[%s6559_s1 + $0x110] sm:$0xf0]  ;;  %v3235_v58 = vor.u32 %v4248_v53, %v3234_v52  ;;  %v4173_v60 = vld [vmem:[%s6559_s1 + $0x38] sm:$0xf0] }
   0xf   :  { %2018 = vmatpush.bf16.msra.mxu1 %v3067_v38  ;;  %v3126_v61 = vld [vmem:[%s6559_s1 + $0x1b0] sm:$0xf]  ;;  %v3043_v62 = vor.u32 %v4200_v55, %v3042_v54  ;;  %v4221_v63 = vld [vmem:[%s6559_s1 + $0x1b8] sm:$0xf0]  ;;  %v2935_v4 = vor.u32 %v4173_v60, %v2934_v59  ;;  %v2922_v7 = vld [vmem:[%s6559_s1 + $0x18] sm:$0xf] }
  0x10   :  { %2005 = vmatpush.bf16.msra.mxu0 %v2959_v44  ;;  %v3222_v0 = vld [vmem:[%s6559_s1 + $0x270] sm:$0xf]  ;;  %v4245_v1 = vld [vmem:[%s6559_s1 + $0x278] sm:$0xf0]  ;;  %v3127_v5 = vor.u32 %v4221_v63, %v3126_v61  ;;  %v4170_v8 = vld [vmem:[%s6559_s1 + $0x20] sm:$0xf0] }
  0x11   :  { %2033 = vmatpush.bf16.msra.mxu2 %v3151_v45  ;;  %v3030_v2 = vld [vmem:[%s6559_s1 + $0xf0] sm:$0xf]  ;;  %v4197_v3 = vld [vmem:[%s6559_s1 + $0xf8] sm:$0xf0]  ;;  %v3223_v6 = vor.u32 %v4245_v1, %v3222_v0  ;;  %v3114_v9 = vld [vmem:[%s6559_s1 + $0x198] sm:$0xf]  ;;  %v2923_v16 = vor.u32 %v4170_v8, %v2922_v7 }
  0x12   :  { %2047 = vmatpush.bf16.msra.mxu3 %v3247_v46  ;;  %v3031_v10 = vor.u32 %v4197_v3, %v3030_v2  ;;  %v4218_v11 = vld [vmem:[%s6559_s1 + $0x1a0] sm:$0xf0]  ;;  %v3210_v12 = vld [vmem:[%s6559_s1 + $0x258] sm:$0xf]  ;;  %v2910_v17 = vld [vmem:[%s6559_s1] sm:$0xf] }
  0x13   :  { %2019 = vmatpush.bf16.msra.mxu1 %v3055_v50  ;;  %v4242_v13 = vld [vmem:[%s6559_s1 + $0x260] sm:$0xf0]  ;;  %v3018_v14 = vld [vmem:[%s6559_s1 + $0xd8] sm:$0xf]  ;;  %v4167_v18 = vld [vmem:[%s6559_s1 + $0x8] sm:$0xf0]  ;;  %v3115_v19 = vor.u32 %v4218_v11, %v3114_v9 }
  0x14   :  { %2006 = vmatpush.bf16.msra.mxu0 %v2947_v56  ;;  %v4194_v15 = vld [vmem:[%s6559_s1 + $0xe0] sm:$0xf0]  ;;  %v3211_v20 = vor.u32 %v4242_v13, %v3210_v12  ;;  %v3102_v21 = vld [vmem:[%s6559_s1 + $0x180] sm:$0xf]  ;;  %v4215_v22 = vld [vmem:[%s6559_s1 + $0x188] sm:$0xf0]  ;;  %v2911_v31 = vor.u32 %v4167_v18, %v2910_v17 }
  0x15   :  { %2034 = vmatpush.bf16.msra.mxu2 %v3139_v57  ;;  %v3198_v23 = vld [vmem:[%s6559_s1 + $0x240] sm:$0xf]  ;;  %v3019_v24 = vor.u32 %v4194_v15, %v3018_v14  ;;  %v4239_v25 = vld [vmem:[%s6559_s1 + $0x248] sm:$0xf0]  ;;  %v3378_v26 = vld [vmem:[%s6559_s1 + $0x3a8] sm:$0xf]  ;;  %v3103_v35 = vor.u32 %v4215_v22, %v3102_v21 }
  0x16   :  { %2048 = vmatpush.bf16.msra.mxu3 %v3235_v58  ;;  %v4284_v27 = vld [vmem:[%s6559_s1 + $0x3b0] sm:$0xf0]  ;;  %v3570_v28 = vld [vmem:[%s6559_s1 + $0x528] sm:$0xf]  ;;  %v3006_v33 = vld [vmem:[%s6559_s1 + $0xc0] sm:$0xf]  ;;  %v3199_v36 = vor.u32 %v4239_v25, %v3198_v23 }
  0x17   :  { %2020 = vmatpush.bf16.msra.mxu1 %v3043_v62  ;;  %v4332_v29 = vld [vmem:[%s6559_s1 + $0x530] sm:$0xf0]  ;;  %v3666_v30 = vld [vmem:[%s6559_s1 + $0x5e8] sm:$0xf]  ;;  %v4191_v34 = vld [vmem:[%s6559_s1 + $0xc8] sm:$0xf0]  ;;  %v3379_v39 = vor.u32 %v4284_v27, %v3378_v26 }
  0x18   :  { %2007 = vmatpush.bf16.msra.mxu0 %v2935_v4  ;;  %v4356_v32 = vld [vmem:[%s6559_s1 + $0x5f0] sm:$0xf0]  ;;  %v3474_v37 = vld [vmem:[%s6559_s1 + $0x468] sm:$0xf]  ;;  %v3571_v40 = vor.u32 %v4332_v29, %v3570_v28  ;;  %v3366_v41 = vld [vmem:[%s6559_s1 + $0x390] sm:$0xf]  ;;  %v3007_v44 = vor.u32 %v4191_v34, %v3006_v33 }
  0x19   :  { %2035 = vmatpush.bf16.msra.mxu2 %v3127_v5  ;;  %v4308_v38 = vld [vmem:[%s6559_s1 + $0x470] sm:$0xf0]  ;;  %v4281_v42 = vld [vmem:[%s6559_s1 + $0x398] sm:$0xf0]  ;;  %v3667_v43 = vor.u32 %v4356_v32, %v3666_v30  ;;  %v3558_v45 = vld [vmem:[%s6559_s1 + $0x510] sm:$0xf] }
  0x1a   :  { %2049 = vmatpush.bf16.msra.mxu3 %v3223_v6  ;;  %v4329_v46 = vld [vmem:[%s6559_s1 + $0x518] sm:$0xf0]  ;;  %v3654_v47 = vld [vmem:[%s6559_s1 + $0x5d0] sm:$0xf]  ;;  %v3475_v48 = vor.u32 %v4308_v38, %v3474_v37  ;;  %v3354_v52 = vld [vmem:[%s6559_s1 + $0x378] sm:$0xf]  ;;  %v3367_v56 = vor.u32 %v4281_v42, %v3366_v41 }
  0x1b   :  { %2021 = vmatpush.bf16.msra.mxu1 %v3031_v10  ;;  %v4353_v49 = vld [vmem:[%s6559_s1 + $0x5d8] sm:$0xf0]  ;;  %v3462_v50 = vld [vmem:[%s6559_s1 + $0x450] sm:$0xf]  ;;  %v2862_v53 = vld [vmem:[%s6560_s0] sm:$0xf]  ;;  %v3559_v57 = vor.u32 %v4329_v46, %v3558_v45 }
  0x1c   :  { %2008 = vmatpush.bf16.msra.mxu0 %v2923_v16  ;;  %v4305_v51 = vld [vmem:[%s6559_s1 + $0x458] sm:$0xf0]  ;;  %v4160_v54 = vld [vmem:[%s6560_s0 + $0x2c] sm:$0xf0]  ;;  %v2870_v55 = vld [vmem:[%s6560_s0 + $0x8] sm:$0xf]  ;;  %v3655_v62 = vor.u32 %v4353_v49, %v3654_v47 }
  0x1d   :  { %2036 = vmatpush.bf16.msra.mxu2 %v3115_v19  ;;  %v4278_v58 = vld [vmem:[%s6559_s1 + $0x380] sm:$0xf0]  ;;  %v3546_v59 = vld [vmem:[%s6559_s1 + $0x4f8] sm:$0xf]  ;;  %v4780_v60 = vor.u32 %v4160_v54, %v2862_v53  ;;  %v3463_v3 = vor.u32 %v4305_v51, %v3462_v50  ;;  %v2864_v6 = vld [vmem:[%s6560_s0 + $0x30] sm:$0xf0] }
  0x1e   :  { %2050 = vmatpush.bf16.msra.mxu3 %v3211_v20  ;;  %v4161_v61 = vld [vmem:[%s6560_s0 + $0x34] sm:$0xf0]  ;;  %v4326_v63 = vld [vmem:[%s6559_s1 + $0x500] sm:$0xf0]  ;;  %v4155_v9 = vld [vmem:[%s6560_s0 + $0xc] sm:$0xf]  ;;  %v3355_v11 = vor.u32 %v4278_v58, %v3354_v52 }
  0x1f   :  { %2022 = vmatpush.bf16.msra.mxu1 %v3019_v24  ;;  %v3642_v0 = vld [vmem:[%s6559_s1 + $0x5b8] sm:$0xf]  ;;  %v4350_v1 = vld [vmem:[%s6559_s1 + $0x5c0] sm:$0xf0]  ;;  %v4794_v2 = vor.u32 %v4161_v61, %v2870_v55  ;;  %v2872_v10 = vld [vmem:[%s6560_s0 + $0x38] sm:$0xf0]  ;;  %v3547_v12 = vor.u32 %v4326_v63, %v3546_v59 }
  0x20   :  { %2009 = vmatpush.bf16.msra.mxu0 %v2911_v31  ;;  %v3450_v4 = vld [vmem:[%s6559_s1 + $0x438] sm:$0xf]  ;;  %v4154_v5 = vld [vmem:[%s6560_s0 + $0x4] sm:$0xf]  ;;  %v3342_v13 = vld [vmem:[%s6559_s1 + $0x360] sm:$0xf]  ;;  %v4821_v14 = vor.u32 %v4155_v9, %v2872_v10  ;;  %v3643_v15 = vor.u32 %v4350_v1, %v3642_v0 }
  0x21   :  { %2037 = vmatpush.bf16.msra.mxu2 %v3103_v35  ;;  %v4302_v7 = vld [vmem:[%s6559_s1 + $0x440] sm:$0xf0]  ;;  %v4810_v8 = vor.u32 %v4154_v5, %v2864_v6  ;;  %v4275_v16 = vld [vmem:[%s6559_s1 + $0x368] sm:$0xf0]  ;;  %v3534_v17 = vld [vmem:[%s6559_s1 + $0x4e0] sm:$0xf] }
  0x22   :  { %2051 = vmatpush.bf16.msra.mxu3 %v3199_v36  ;;  %v4323_v18 = vld [vmem:[%s6559_s1 + $0x4e8] sm:$0xf0]  ;;  %v3451_v19 = vor.u32 %v4302_v7, %v3450_v4  ;;  %v3630_v20 = vld [vmem:[%s6559_s1 + $0x5a0] sm:$0xf]  ;;  %v3343_v24 = vor.u32 %v4275_v16, %v3342_v13  ;;  %v3330_v26 = vld [vmem:[%s6559_s1 + $0x348] sm:$0xf] }
  0x23   :  { %2023 = vmatpush.bf16.msra.mxu1 %v3007_v44  ;;  %2010 = vmatmul.bf16.vlgmr.msra.gmra.mxu0 %v4780_v60  ;;  %v4347_v21 = vld [vmem:[%s6559_s1 + $0x5a8] sm:$0xf0]  ;;  %v3438_v22 = vld [vmem:[%s6559_s1 + $0x420] sm:$0xf]  ;;  %v3535_v25 = vor.u32 %v4323_v18, %v3534_v17  ;;  %v4272_v28 = vld [vmem:[%s6559_s1 + $0x350] sm:$0xf0] }
  0x24   :  { %2058 = vmatpush.bf16.msrb.mxu0 %v3379_v39  ;;  %2038 = vmatmul.bf16.vlgmr.msra.gmra.mxu2 %v4794_v2  ;;  %v4299_v23 = vld [vmem:[%s6559_s1 + $0x428] sm:$0xf0]  ;;  %v3631_v27 = vor.u32 %v4347_v21, %v3630_v20  ;;  %v3522_v29 = vld [vmem:[%s6559_s1 + $0x4c8] sm:$0xf]  ;;  %v4320_v30 = vld [vmem:[%s6559_s1 + $0x4d0] sm:$0xf0]  ;;  %v3331_v36 = vor.u32 %v4272_v28, %v3330_v26 }
  0x25   :  { %2086 = vmatpush.bf16.msrb.mxu2 %v3571_v40  ;;  %2052 = vmatmul.bf16.vlgmr.msra.gmra.mxu3 %v4821_v14  ;;  %v3439_v31 = vor.u32 %v4299_v23, %v3438_v22  ;;  %v3618_v32 = vld [vmem:[%s6559_s1 + $0x588] sm:$0xf]  ;;  %v4344_v33 = vld [vmem:[%s6559_s1 + $0x590] sm:$0xf0]  ;;  %v3523_v37 = vor.u32 %v4320_v30, %v3522_v29  ;;  %v3318_v38 = vld [vmem:[%s6559_s1 + $0x330] sm:$0xf] }
  0x26   :  { %2100 = vmatpush.bf16.msrb.mxu3 %v3667_v43  ;;  %2024 = vmatmul.bf16.vlgmr.msra.gmra.mxu1 %v4810_v8  ;;  %v3426_v34 = vld [vmem:[%s6559_s1 + $0x408] sm:$0xf]  ;;  %v4296_v35 = vld [vmem:[%s6559_s1 + $0x410] sm:$0xf0]  ;;  %v3619_v39 = vor.u32 %v4344_v33, %v3618_v32  ;;  %v4269_v40 = vld [vmem:[%s6559_s1 + $0x338] sm:$0xf0] }
  0x27   :  { %2072 = vmatpush.bf16.msrb.mxu1 %v3475_v48  ;;  %v3510_v41 = vld [vmem:[%s6559_s1 + $0x4b0] sm:$0xf]  ;;  %v4317_v42 = vld [vmem:[%s6559_s1 + $0x4b8] sm:$0xf0]  ;;  %v3427_v43 = vor.u32 %v4296_v35, %v3426_v34  ;;  %v3319_v48 = vor.u32 %v4269_v40, %v3318_v38  ;;  %v3306_v50 = vld [vmem:[%s6559_s1 + $0x318] sm:$0xf] }
  0x28   :  { %2059 = vmatpush.bf16.msrb.mxu0 %v3367_v56  ;;  %v3606_v44 = vld [vmem:[%s6559_s1 + $0x570] sm:$0xf]  ;;  %v4341_v45 = vld [vmem:[%s6559_s1 + $0x578] sm:$0xf0]  ;;  %v3511_v49 = vor.u32 %v4317_v42, %v3510_v41  ;;  %v4266_v51 = vld [vmem:[%s6559_s1 + $0x320] sm:$0xf0] }
  0x29   :  { %2087 = vmatpush.bf16.msrb.mxu2 %v3559_v57  ;;  %v3414_v46 = vld [vmem:[%s6559_s1 + $0x3f0] sm:$0xf]  ;;  %v4293_v47 = vld [vmem:[%s6559_s1 + $0x3f8] sm:$0xf0]  ;;  %v3607_v53 = vor.u32 %v4341_v45, %v3606_v44  ;;  %v3498_v54 = vld [vmem:[%s6559_s1 + $0x498] sm:$0xf]  ;;  %v3307_v4 = vor.u32 %v4266_v51, %v3306_v50 }
  0x2a   :  { %2101 = vmatpush.bf16.msrb.mxu3 %v3655_v62  ;;  %v4903_v52 = vld [vmem:[%s6559_s1 + $0x8d0] sm:$0xff]  ;;  %v4314_v55 = vld [vmem:[%s6559_s1 + $0x4a0] sm:$0xf0]  ;;  %v3594_v56 = vld [vmem:[%s6559_s1 + $0x558] sm:$0xf]  ;;  %v3415_v57 = vor.u32 %v4293_v47, %v3414_v46  ;;  %vm2836_vm4 = vcmask 1046528  }
  0x2b   :  { %2073 = vmatpush.bf16.msrb.mxu1 %v3463_v3  ;;  %v4338_v58 = vld [vmem:[%s6559_s1 + $0x560] sm:$0xf0]  ;;  %v3402_v59 = vld [vmem:[%s6559_s1 + $0x3d8] sm:$0xf]  ;;  %v3294_v62 = vld [vmem:[%s6559_s1 + $0x300] sm:$0xf]  ;;  %v1418_v3 = vunpack.c.l.b16 %v4903_v52  ;;  %v3499_v5 = vor.u32 %v4314_v55, %v3498_v54 }
  0x2c   :  { %2060 = vmatpush.bf16.msrb.mxu0 %v3355_v11  ;;  %v4290_v61 = vld [vmem:[%s6559_s1 + $0x3e0] sm:$0xf0]  ;;  %v4263_v63 = vld [vmem:[%s6559_s1 + $0x308] sm:$0xf0]  ;;  %v3486_v0 = vld [vmem:[%s6559_s1 + $0x480] sm:$0xf]  ;;  %v3595_v10 = vor.u32 %v4338_v58, %v3594_v56 }
  0x2d   :  { %2088 = vmatpush.bf16.msrb.mxu2 %v3547_v12  ;;  %v4311_v1 = vld [vmem:[%s6559_s1 + $0x488] sm:$0xf0]  ;;  %v3582_v6 = vld [vmem:[%s6559_s1 + $0x540] sm:$0xf]  ;;  %v3762_v9 = vld [vmem:[%s6559_s1 + $0x6a8] sm:$0xf]  ;;  %v1703_v18 = vpack.c.b16 %v1418_v3, %v1418_v3  ;;  %v3295_v22 = vor.u32 %v4263_v63, %v3294_v62 }
  0x2e   :  { %2102 = vmatpush.bf16.msrb.mxu3 %v3643_v15  ;;  %v4335_v7 = vld [vmem:[%s6559_s1 + $0x548] sm:$0xf0]  ;;  %v4380_v11 = vld [vmem:[%s6559_s1 + $0x6b0] sm:$0xf0]  ;;  %v3954_v12 = vld [vmem:[%s6559_s1 + $0x828] sm:$0xf]  ;;  %v3403_v15 = vor.u32 %v4290_v61, %v3402_v59  ;;  %v3487_v23 = vor.u32 %v4311_v1, %v3486_v0 }
  0x2f   :  { %2074 = vmatpush.bf16.msrb.mxu1 %v3451_v19  ;;  %v4428_v13 = vld [vmem:[%s6559_s1 + $0x830] sm:$0xf0]  ;;  %v3390_v16 = vld [vmem:[%s6559_s1 + $0x3c0] sm:$0xf]  ;;  %v4287_v17 = vld [vmem:[%s6559_s1 + $0x3c8] sm:$0xf0]  ;;  %v3763_v28 = vor.u32 %v4380_v11, %v3762_v9 }
  0x30   :  { %2061 = vmatpush.bf16.msrb.mxu0 %v3343_v24  ;;  %v2878_v19 = vld [vmem:[%s6560_s0 + $0x10] sm:$0xf]  ;;  %v4162_v20 = vld [vmem:[%s6560_s0 + $0x3c] sm:$0xf0]  ;;  %v2886_v21 = vld [vmem:[%s6560_s0 + $0x18] sm:$0xf]  ;;  %v3955_v32 = vor.u32 %v4428_v13, %v3954_v12 }
  0x31   :  { %2089 = vmatpush.bf16.msrb.mxu2 %v3535_v25  ;;  %v4163_v24 = vld [vmem:[%s6560_s0 + $0x44] sm:$0xf0]  ;;  %v4404_v26 = vld [vmem:[%s6559_s1 + $0x770] sm:$0xf0]  ;;  %v2880_v30 = vld [vmem:[%s6560_s0 + $0x40] sm:$0xf0]  ;;  %v4997_v38 = vor.u32 %v4162_v20, %v2878_v19 }
  0x32   :  { %2103 = vmatpush.bf16.msrb.mxu3 %v3631_v27  ;;  %v3858_v25 = vld [vmem:[%s6559_s1 + $0x768] sm:$0xf]  ;;  %v3583_v27 = vor.u32 %v4335_v7, %v3582_v6  ;;  %v4156_v29 = vld [vmem:[%s6560_s0 + $0x14] sm:$0xf]  ;;  %v2888_v33 = vld [vmem:[%s6560_s0 + $0x48] sm:$0xf0]  ;;  %v5005_v41 = vor.u32 %v4163_v24, %v2886_v21 }
  0x33   :  { %2075 = vmatpush.bf16.msrb.mxu1 %v3439_v31  ;;  %v4157_v31 = vld [vmem:[%s6560_s0 + $0x1c] sm:$0xf]  ;;  %v3750_v34 = vld [vmem:[%s6559_s1 + $0x690] sm:$0xf]  ;;  %v3859_v42 = vor.u32 %v4404_v26, %v3858_v25  ;;  %v4446_v44 = vld [vmem:[%s6559_s1 + $0x8c0] sm:$0xf0] }
  0x34   :  { %2062 = vmatpush.bf16.msrb.mxu0 %v3331_v36  ;;  %v4377_v35 = vld [vmem:[%s6559_s1 + $0x698] sm:$0xf0]  ;;  %v1994_v36 = vsel %vm1992_vm0, %v1703_v18, 0  ;;  %v5013_v45 = vor.u32 %v4157_v31, %v2888_v33  ;;  %v3846_v47 = vld [vmem:[%s6559_s1 + $0x750] sm:$0xf]  ;;  %vm2749_vm5 = vcmask 15360  }
  0x35   :  { %2090 = vmatpush.bf16.msrb.mxu2 %v3523_v37  ;;  %v3391_v37 = vor.u32 %v4287_v17, %v3390_v16  ;;  %v4425_v40 = vld [vmem:[%s6559_s1 + $0x818] sm:$0xf0]  ;;  %v3751_v46 = vor.u32 %v4377_v35, %v3750_v34  ;;  %v3738_v51 = vld [vmem:[%s6559_s1 + $0x678] sm:$0xf]  ;;  %v4422_v56 = vld [vmem:[%s6559_s1 + $0x800] sm:$0xf0] }
  0x36   :  { %2104 = vmatpush.bf16.msrb.mxu3 %v3619_v39  ;;  %v3942_v39 = vld [vmem:[%s6559_s1 + $0x810] sm:$0xf]  ;;  %v3930_v55 = vld [vmem:[%s6559_s1 + $0x7f8] sm:$0xf]  ;;  %v4014_v58 = vld [vmem:[%s6559_s1 + $0x8a0] sm:$0xf] }
  0x37   :  { %2076 = vmatpush.bf16.msrb.mxu1 %v3427_v43  ;;  %v4026_v43 = vld [vmem:[%s6559_s1 + $0x8b8] sm:$0xf]  ;;  %v3943_v50 = vor.u32 %v4425_v40, %v3942_v39  ;;  %v4443_v59 = vld [vmem:[%s6559_s1 + $0x8a8] sm:$0xf0]  ;;  %v4398_v63 = vld [vmem:[%s6559_s1 + $0x740] sm:$0xf0]  ;;  %v3931_v0 = vor.u32 %v4422_v56, %v3930_v55 }
  0x38   :  { %2063 = vmatpush.bf16.msrb.mxu0 %v3319_v48  ;;  %v4401_v48 = vld [vmem:[%s6559_s1 + $0x758] sm:$0xf0]  ;;  %v4027_v54 = vor.u32 %v4446_v44, %v4026_v43  ;;  %v3834_v62 = vld [vmem:[%s6559_s1 + $0x738] sm:$0xf]  ;;  %v3726_v1 = vld [vmem:[%s6559_s1 + $0x660] sm:$0xf] }
  0x39   :  { %2091 = vmatpush.bf16.msrb.mxu2 %v3511_v49  ;;  %v5021_v49 = vor.u32 %v4156_v29, %v2880_v30  ;;  %v4371_v3 = vld [vmem:[%s6559_s1 + $0x668] sm:$0xf0]  ;;  %v3835_v7 = vor.u32 %v4398_v63, %v3834_v62  ;;  %v4002_v9 = vld [vmem:[%s6559_s1 + $0x888] sm:$0xf]  ;;  %v3822_v12 = vld [vmem:[%s6559_s1 + $0x720] sm:$0xf] }
  0x3a   :  { %2105 = vmatpush.bf16.msrb.mxu3 %v3607_v53  ;;  %v4374_v53 = vld [vmem:[%s6559_s1 + $0x680] sm:$0xf0]  ;;  %v4419_v6 = vld [vmem:[%s6559_s1 + $0x7e8] sm:$0xf0]  ;;  %v3727_v11 = vor.u32 %v4371_v3, %v3726_v1  ;;  %v3714_v16 = vld [vmem:[%s6559_s1 + $0x648] sm:$0xf] }
  0x3b   :  { %2077 = vmatpush.bf16.msrb.mxu1 %v3415_v57  ;;  %v3847_v57 = vor.u32 %v4401_v48, %v3846_v47  ;;  %v3739_v61 = vor.u32 %v4374_v53, %v3738_v51  ;;  %v4395_v13 = vld [vmem:[%s6559_s1 + $0x728] sm:$0xf0]  ;;  %v4368_v17 = vld [vmem:[%s6559_s1 + $0x650] sm:$0xf0]  ;;  %v3906_v19 = vld [vmem:[%s6559_s1 + $0x7c8] sm:$0xf] }
  0x3c   :  { %2064 = vmatpush.bf16.msrb.mxu0 %v3307_v4  ;;  %v4015_v4 = vor.u32 %v4443_v59, %v4014_v58  ;;  %v4416_v20 = vld [vmem:[%s6559_s1 + $0x7d0] sm:$0xf0]  ;;  %v3823_v21 = vor.u32 %v4395_v13, %v3822_v12  ;;  %v3715_v24 = vor.u32 %v4368_v17, %v3714_v16  ;;  %v3810_v25 = vld [vmem:[%s6559_s1 + $0x708] sm:$0xf]  ;;  %v4365_v29 = vld [vmem:[%s6559_s1 + $0x638] sm:$0xf0] }
  0x3d   :  { %2092 = vmatpush.bf16.msrb.mxu2 %v3499_v5  ;;  %v3918_v5 = vld [vmem:[%s6559_s1 + $0x7e0] sm:$0xf]  ;;  %v4392_v26 = vld [vmem:[%s6559_s1 + $0x710] sm:$0xf0]  ;;  %v3894_v31 = vld [vmem:[%s6559_s1 + $0x7b0] sm:$0xf] }
  0x3e   :  { %2106 = vmatpush.bf16.msrb.mxu3 %v3595_v10  ;;  %v4440_v10 = vld [vmem:[%s6559_s1 + $0x890] sm:$0xf0]  ;;  %v3811_v33 = vor.u32 %v4392_v26, %v3810_v25  ;;  %v3978_v34 = vld [vmem:[%s6559_s1 + $0x858] sm:$0xf]  ;;  %v4434_v35 = vld [vmem:[%s6559_s1 + $0x860] sm:$0xf0] }
  0x3f   :  { %2078 = vmatpush.bf16.msrb.mxu1 %v3403_v15  ;;  %v3919_v15 = vor.u32 %v4419_v6, %v3918_v5  ;;  %v4003_v18 = vor.u32 %v4440_v10, %v4002_v9  ;;  %v4389_v39 = vld [vmem:[%s6559_s1 + $0x6f8] sm:$0xf0]  ;;  %v3690_v40 = vld [vmem:[%s6559_s1 + $0x618] sm:$0xf]  ;;  %v3966_v47 = vld [vmem:[%s6559_s1 + $0x840] sm:$0xf]  ;;  %v3979_v48 = vor.u32 %v4434_v35, %v3978_v34 }
  0x40   :  { %2065 = vmatpush.bf16.msrb.mxu0 %v3295_v22  ;;  %v3990_v22 = vld [vmem:[%s6559_s1 + $0x870] sm:$0xf]  ;;  %v3882_v44 = vld [vmem:[%s6559_s1 + $0x798] sm:$0xf]  ;;  %v4187_v51 = vld [vmem:[%s6559_s1 + $0xac] sm:$0xf] }
  0x41   :  { %2093 = vmatpush.bf16.msrb.mxu2 %v3487_v23  ;;  %v4437_v23 = vld [vmem:[%s6559_s1 + $0x878] sm:$0xf0]  ;;  %v2996_v53 = vld [vmem:[%s6559_s1 + $0xb4] sm:$0xf0]  ;;  %v4386_v56 = vld [vmem:[%s6559_s1 + $0x6e0] sm:$0xf0] }
  0x42   :  { %2107 = vmatpush.bf16.msrb.mxu3 %v3583_v27  ;;  %v3907_v27 = vor.u32 %v4416_v20, %v3906_v19  ;;  %v3991_v30 = vor.u32 %v4437_v23, %v3990_v22  ;;  %v3786_v55 = vld [vmem:[%s6559_s1 + $0x6d8] sm:$0xf]  ;;  %v4359_v59 = vld [vmem:[%s6559_s1 + $0x608] sm:$0xf0]  ;;  %v4184_v5 = vld [vmem:[%s6559_s1 + $0x94] sm:$0xf] }
  0x43   :  { %2079 = vmatpush.bf16.msrb.mxu1 %v3391_v37  ;;  %2066 = vmatmul.bf16.vlgmr.msrb.gmra.mxu0 %v4997_v38  ;;  %v4407_v62 = vld [vmem:[%s6559_s1 + $0x788] sm:$0xf0]  ;;  %v3092_v1 = vld [vmem:[%s6559_s1 + $0x174] sm:$0xf0]  ;;  %v2984_v6 = vld [vmem:[%s6559_s1 + $0x9c] sm:$0xf0]  ;;  %v3787_v12 = vor.u32 %v4386_v56, %v3786_v55 }
  0x44   :  { %2114 = vmatpush.bf16.msra.mxu0 %v3763_v28  ;;  %2094 = vmatmul.bf16.vlgmr.msrb.gmra.mxu2 %v5005_v41  ;;  %v3702_v28 = vld [vmem:[%s6559_s1 + $0x630] sm:$0xf]  ;;  %v4259_v3 = vld [vmem:[%s6559_s1 + $0x2ec] sm:$0xf]  ;;  %v3774_v9 = vld [vmem:[%s6559_s1 + $0x6c0] sm:$0xf] }
  0x45   :  { %2142 = vmatpush.bf16.msra.mxu2 %v3955_v32  ;;  %2108 = vmatmul.bf16.vlgmr.msrb.gmra.mxu3 %v5013_v45  ;;  %v4413_v32 = vld [vmem:[%s6559_s1 + $0x7b8] sm:$0xf0]  ;;  %v3703_v37 = vor.u32 %v4365_v29, %v3702_v28  ;;  %v4383_v10 = vld [vmem:[%s6559_s1 + $0x6c8] sm:$0xf0]  ;;  %v2894_v13 = vld [vmem:[%s6560_s0 + $0x20] sm:$0xf] }
  0x46   :  { %2157 = vmatpush.bf16.msra.mxu3 %v1994_v36  ;;  %2080 = vmatmul.bf16.vlgmr.msrb.gmra.mxu1 %v5021_v49  ;;  %v3798_v36 = vld [vmem:[%s6559_s1 + $0x6f0] sm:$0xf]  ;;  %v3895_v43 = vor.u32 %v4413_v32, %v3894_v31  ;;  %v2904_v16 = vld [vmem:[%s6560_s0 + $0x58] sm:$0xf0]  ;;  %v2902_v19 = vld [vmem:[%s6560_s0 + $0x28] sm:$0xf]  ;;  %v2987_v31 = vor.u32 %v4184_v5, %v2984_v6  ;;  %v3775_v32 = vor.u32 %v4383_v10, %v3774_v9 }
  0x47   :  { %2128 = vmatpush.bf16.msra.mxu1 %v3859_v42  ;;  %v4362_v42 = vld [vmem:[%s6559_s1 + $0x620] sm:$0xf0]  ;;  %v4165_v20 = vld [vmem:[%s6560_s0 + $0x54] sm:$0xf0]  ;;  %v4208_v25 = vld [vmem:[%s6559_s1 + $0x154] sm:$0xf] }
  0x48   :  { %2115 = vmatpush.bf16.msra.mxu0 %v3751_v46  ;;  %v4410_v46 = vld [vmem:[%s6559_s1 + $0x7a0] sm:$0xf0]  ;;  %v3691_v58 = vor.u32 %v4362_v42, %v3690_v40  ;;  %v3080_v28 = vld [vmem:[%s6559_s1 + $0x15c] sm:$0xf0]  ;;  %v4235_v29 = vld [vmem:[%s6559_s1 + $0x22c] sm:$0xf] }
  0x49   :  { %2143 = vmatpush.bf16.msra.mxu2 %v3943_v50  ;;  %v4431_v50 = vld [vmem:[%s6559_s1 + $0x848] sm:$0xf0]  ;;  %v3883_v63 = vor.u32 %v4410_v46, %v3882_v44  ;;  %v4158_v23 = vld [vmem:[%s6560_s0 + $0x24] sm:$0xf]  ;;  %v3272_v34 = vld [vmem:[%s6559_s1 + $0x2dc] sm:$0xf0]  ;;  %v3083_v40 = vor.u32 %v4208_v25, %v3080_v28 }
  0x4a   :  { %2158 = vmatpush.bf16.msra.mxu3 %v4027_v54  ;;  %v3799_v54 = vor.u32 %v4389_v39, %v3798_v36  ;;  %v5235_v36 = vor.u32 %v4165_v20, %v2902_v19  ;;  %v2972_v39 = vld [vmem:[%s6559_s1 + $0x84] sm:$0xf0]  ;;  %v4178_v55 = vld [vmem:[%s6559_s1 + $0x64] sm:$0xf]  ;;  %v2960_v56 = vld [vmem:[%s6559_s1 + $0x6c] sm:$0xf0] }
  0x4b   :  { %2129 = vmatpush.bf16.msra.mxu1 %v3847_v57  ;;  %v3678_v57 = vld [vmem:[%s6559_s1 + $0x600] sm:$0xf]  ;;  %v4175_v5 = vld [vmem:[%s6559_s1 + $0x4c] sm:$0xf]  ;;  %v2948_v6 = vld [vmem:[%s6559_s1 + $0x54] sm:$0xf0] }
  0x4c   :  { %2116 = vmatpush.bf16.msra.mxu0 %v3739_v61  ;;  %v3870_v61 = vld [vmem:[%s6559_s1 + $0x780] sm:$0xf]  ;;  %v3679_v17 = vor.u32 %v4359_v59, %v3678_v57  ;;  %v4202_v59 = vld [vmem:[%s6559_s1 + $0x124] sm:$0xf]  ;;  %v4199_v10 = vld [vmem:[%s6559_s1 + $0x10c] sm:$0xf] }
  0x4d   :  { %2144 = vmatpush.bf16.msra.mxu2 %v3931_v0  ;;  %v4211_v0 = vld [vmem:[%s6559_s1 + $0x16c] sm:$0xf]  ;;  %v4172_v19 = vld [vmem:[%s6559_s1 + $0x34] sm:$0xf]  ;;  %v2936_v20 = vld [vmem:[%s6559_s1 + $0x3c] sm:$0xf0] }
  0x4e   :  { %2159 = vmatpush.bf16.msra.mxu3 %v4015_v4  ;;  %v3967_v4 = vor.u32 %v4431_v50, %v3966_v47  ;;  %v3095_v22 = vor.u32 %v4211_v0, %v3092_v1  ;;  %v3068_v47 = vld [vmem:[%s6559_s1 + $0x144] sm:$0xf0]  ;;  %v3176_v50 = vld [vmem:[%s6559_s1 + $0x21c] sm:$0xf0]  ;;  %v2963_v1 = vor.u32 %v4178_v55, %v2960_v56  ;;  %v3140_v28 = vld [vmem:[%s6559_s1 + $0x1d4] sm:$0xf0] }
  0x4f   :  { %2130 = vmatpush.bf16.msra.mxu1 %v3835_v7  ;;  %v3284_v7 = vld [vmem:[%s6559_s1 + $0x2f4] sm:$0xf0]  ;;  %v3164_v0 = vld [vmem:[%s6559_s1 + $0x204] sm:$0xf0]  ;;  %v3032_v25 = vld [vmem:[%s6559_s1 + $0xfc] sm:$0xf0] }
  0x50   :  { %2117 = vmatpush.bf16.msra.mxu0 %v3727_v11  ;;  %v2999_v11 = vor.u32 %v4187_v51, %v2996_v53  ;;  %v3287_v26 = vor.u32 %v4259_v3, %v3284_v7  ;;  %v4253_v53 = vld [vmem:[%s6559_s1 + $0x2bc] sm:$0xf]  ;;  %v4250_v3 = vld [vmem:[%s6559_s1 + $0x2a4] sm:$0xf]  ;;  %vm2832_vm6 = vcmask 1031168  }
  0x51   :  { %2145 = vmatpush.bf16.msra.mxu2 %v3919_v15  ;;  %v4159_v15 = vld [vmem:[%s6560_s0 + $0x2c] sm:$0xf] }
  0x52   :  { %2160 = vmatpush.bf16.msra.mxu3 %v4003_v18  ;;  %v4164_v18 = vld [vmem:[%s6560_s0 + $0x4c] sm:$0xf0] }
  0x53   :  { %2131 = vmatpush.bf16.msra.mxu1 %v3823_v21  ;;  %v3871_v21 = vor.u32 %v4407_v62, %v3870_v61  ;;  %v5233_v35 = vor.u32 %v4164_v18, %v2894_v13  ;;  %v3056_v62 = vld [vmem:[%s6559_s1 + $0x12c] sm:$0xf0]  ;;  %v4226_v13 = vld [vmem:[%s6559_s1 + $0x1e4] sm:$0xf]  ;;  %v3236_v18 = vld [vmem:[%s6559_s1 + $0x294] sm:$0xf0] }
  0x54   :  { %2118 = vmatpush.bf16.msra.mxu0 %v3715_v24  ;;  %v2896_v24 = vld [vmem:[%s6560_s0 + $0x50] sm:$0xf0]  ;;  %v3059_v7 = vor.u32 %v4202_v59, %v3056_v62  ;;  %v3008_v59 = vld [vmem:[%s6559_s1 + $0xcc] sm:$0xf0]  ;;  %v4217_v62 = vld [vmem:[%s6559_s1 + $0x19c] sm:$0xf] }
  0x55   :  { %2146 = vmatpush.bf16.msra.mxu2 %v3907_v27  ;;  %v5216_v27 = vor.u32 %v4159_v15, %v2904_v16  ;;  %v5246_v44 = vor.u32 %v4158_v23, %v2896_v24  ;;  %v3152_v15 = vld [vmem:[%s6559_s1 + $0x1ec] sm:$0xf0]  ;;  %v2951_v16 = vor.u32 %v4175_v5, %v2948_v6  ;;  %v4196_v23 = vld [vmem:[%s6559_s1 + $0xf4] sm:$0xf]  ;;  %v3476_v5 = vld [vmem:[%s6559_s1 + $0x474] sm:$0xf0] }
  0x56   :  { %2161 = vmatpush.bf16.msra.mxu3 %v3991_v30  ;;  %v3188_v30 = vld [vmem:[%s6559_s1 + $0x234] sm:$0xf0] }
  0x57   :  { %2132 = vmatpush.bf16.msra.mxu1 %v3811_v33  ;;  %v4256_v33 = vld [vmem:[%s6559_s1 + $0x2d4] sm:$0xf]  ;;  %v3191_v42 = vor.u32 %v4235_v29, %v3188_v30  ;;  %v2939_v29 = vor.u32 %v4172_v19, %v2936_v20 }
  0x58   :  { %2119 = vmatpush.bf16.msra.mxu0 %v3703_v37  ;;  %v4181_v37 = vld [vmem:[%s6559_s1 + $0x7c] sm:$0xf]  ;;  %v3275_v46 = vor.u32 %v4256_v33, %v3272_v34  ;;  %v4244_v30 = vld [vmem:[%s6559_s1 + $0x274] sm:$0xf]  ;;  %v2924_v33 = vld [vmem:[%s6559_s1 + $0x24] sm:$0xf0]  ;;  %v3035_v34 = vor.u32 %v4196_v23, %v3032_v25 }
  0x59   :  { %2147 = vmatpush.bf16.msra.mxu2 %v3895_v43  ;;  %v4205_v43 = vld [vmem:[%s6559_s1 + $0x13c] sm:$0xf]  ;;  %v2975_v51 = vor.u32 %v4181_v37, %v2972_v39  ;;  %v4304_v19 = vld [vmem:[%s6559_s1 + $0x454] sm:$0xf]  ;;  %v3572_v23 = vld [vmem:[%s6559_s1 + $0x534] sm:$0xf0] }
  0x5a   :  { %2162 = vmatpush.bf16.msra.mxu3 %v3979_v48  ;;  %v4232_v48 = vld [vmem:[%s6559_s1 + $0x214] sm:$0xf]  ;;  %v3071_v57 = vor.u32 %v4205_v43, %v3068_v47  ;;  %v4193_v39 = vld [vmem:[%s6559_s1 + $0xdc] sm:$0xf] }
  0x5b   :  { %2133 = vmatpush.bf16.msra.mxu1 %v3799_v54  ;;  %v3260_v54 = vld [vmem:[%s6559_s1 + $0x2c4] sm:$0xf0]  ;;  %v4220_v43 = vld [vmem:[%s6559_s1 + $0x1b4] sm:$0xf] }
  0x5c   :  { %2120 = vmatpush.bf16.msra.mxu0 %v3691_v58  ;;  %v3179_v58 = vor.u32 %v4232_v48, %v3176_v50  ;;  %v3263_v61 = vor.u32 %v4253_v53, %v3260_v54  ;;  %v4241_v48 = vld [vmem:[%s6559_s1 + $0x25c] sm:$0xf]  ;;  %v3212_v50 = vld [vmem:[%s6559_s1 + $0x264] sm:$0xf0]  ;;  %v2912_v53 = vld [vmem:[%s6559_s1 + $0xc] sm:$0xf0] }
  0x5d   :  { %2148 = vmatpush.bf16.msra.mxu2 %v3883_v63  ;;  %v4229_v63 = vld [vmem:[%s6559_s1 + $0x1fc] sm:$0xf]  ;;  %v4283_v54 = vld [vmem:[%s6559_s1 + $0x3ac] sm:$0xf]  ;;  %v4352_v25 = vld [vmem:[%s6559_s1 + $0x5d4] sm:$0xf] }
  0x5e   :  { %2163 = vmatpush.bf16.msra.mxu3 %v3967_v4  ;;  %v3248_v4 = vld [vmem:[%s6559_s1 + $0x2ac] sm:$0xf0]  ;;  %v3167_v9 = vor.u32 %v4229_v63, %v3164_v0  ;;  %v3116_v63 = vld [vmem:[%s6559_s1 + $0x1a4] sm:$0xf0]  ;;  %v4238_v0 = vld [vmem:[%s6559_s1 + $0x244] sm:$0xf] }
  0x5f   :  { %2134 = vmatpush.bf16.msra.mxu1 %v3787_v12  ;;  %v3044_v12 = vld [vmem:[%s6559_s1 + $0x114] sm:$0xf0] }
  0x60   :  { %2121 = vmatpush.bf16.msra.mxu0 %v3679_v17  ;;  %v4247_v17 = vld [vmem:[%s6559_s1 + $0x28c] sm:$0xf] }
  0x61   :  { %2149 = vmatpush.bf16.msra.mxu2 %v3871_v21  ;;  %4036 = vmatmul.msk.bf16.vlgmr.msra.gmra.mxu3 %vm1988_vm1, %v5216_v27  ;;  %v3047_v21 = vor.u32 %v4199_v10, %v3044_v12  ;;  %v3239_v24 = vor.u32 %v4247_v17, %v3236_v18  ;;  %v4280_v12 = vld [vmem:[%s6559_s1 + $0x394] sm:$0xf]  ;;  %v4214_v17 = vld [vmem:[%s6559_s1 + $0x184] sm:$0xf]  ;;  %v3104_v18 = vld [vmem:[%s6559_s1 + $0x18c] sm:$0xf0] }
  0x62   :  { %2170 = vmatpush.bf16.msrb.mxu3 %v2999_v11  ;;  %v3251_v11 = vor.u32 %v4250_v3, %v3248_v4  ;;  %v3200_v3 = vld [vmem:[%s6559_s1 + $0x24c] sm:$0xf0]  ;;  %v4307_v4 = vld [vmem:[%s6559_s1 + $0x46c] sm:$0xf] }
  0x63   :  { %2135 = vmatpush.bf16.msra.mxu1 %v3775_v32  ;;  %2122 = vmatmul.bf16.vlgmr.msra.gmra.mxu0 %v5233_v35  ;;  %v4169_v32 = vld [vmem:[%s6559_s1 + $0x1c] sm:$0xf] }
  0x64   :  { %2184 = vmatpush.bf16.msrb.mxu0 %v3095_v22  ;;  %2150 = vmatmul.bf16.vlgmr.msra.gmra.mxu2 %v5235_v36  ;;  %v3155_v22 = vor.u32 %v4226_v13, %v3152_v15  ;;  %v2927_v47 = vor.u32 %v4169_v32, %v2924_v33  ;;  %v3368_v13 = vld [vmem:[%s6559_s1 + $0x39c] sm:$0xf0]  ;;  %v3203_v15 = vor.u32 %v4238_v0, %v3200_v3  ;;  %v4301_v33 = vld [vmem:[%s6559_s1 + $0x43c] sm:$0xf]  ;;  %v4295_v3 = vld [vmem:[%s6559_s1 + $0x40c] sm:$0xf] }
  0x65   :  { %2212 = vmatpush.bf16.msrb.mxu2 %v3287_v26  ;;  %v4223_v26 = vld [vmem:[%s6559_s1 + $0x1cc] sm:$0xf] }
  0x66   :  { %2171 = vmatpush.bf16.msrb.mxu3 %v2987_v31  ;;  %2136 = vmatmul.bf16.vlgmr.msra.gmra.mxu1 %v5246_v44  ;;  %v3224_v31 = vld [vmem:[%s6559_s1 + $0x27c] sm:$0xf0]  ;;  %v3143_v37 = vor.u32 %v4223_v26, %v3140_v28  ;;  %v3107_v28 = vor.u32 %v4214_v17, %v3104_v18  ;;  %v4292_v17 = vld [vmem:[%s6559_s1 + $0x3f4] sm:$0xf] }
  0x67   :  { %2198 = vmatpush.bf16.msrb.mxu1 %v3191_v42  ;;  %v3020_v42 = vld [vmem:[%s6559_s1 + $0xe4] sm:$0xf0]  ;;  %v3656_v26 = vld [vmem:[%s6559_s1 + $0x5dc] sm:$0xf0] }
  0x68   :  { %2185 = vmatpush.bf16.msrb.mxu0 %v3083_v40  ;;  %v3227_v40 = vor.u32 %v4244_v30, %v3224_v31  ;;  %v3023_v55 = vor.u32 %v4193_v39, %v3020_v42  ;;  %v3356_v30 = vld [vmem:[%s6559_s1 + $0x384] sm:$0xf0]  ;;  %v4328_v39 = vld [vmem:[%s6559_s1 + $0x514] sm:$0xf] }
  0x69   :  { %2213 = vmatpush.bf16.msrb.mxu2 %v3275_v46  ;;  %v3128_v46 = vld [vmem:[%s6559_s1 + $0x1bc] sm:$0xf0] }
  0x6a   :  { %2172 = vmatpush.bf16.msrb.mxu3 %v2975_v51  ;;  %v4166_v51 = vld [vmem:[%s6559_s1 + $0x4] sm:$0xf]  ;;  %v3131_v56 = vor.u32 %v4220_v43, %v3128_v46  ;;  %v4349_v43 = vld [vmem:[%s6559_s1 + $0x5bc] sm:$0xf]  ;;  %v3644_v46 = vld [vmem:[%s6559_s1 + $0x5c4] sm:$0xf0] }
  0x6b   :  { %2199 = vmatpush.bf16.msrb.mxu1 %v3179_v58  ;;  %v4190_v58 = vld [vmem:[%s6559_s1 + $0xc4] sm:$0xf] }
  0x6c   :  { %2186 = vmatpush.bf16.msrb.mxu0 %v3071_v57  ;;  %v3380_v57 = vld [vmem:[%s6559_s1 + $0x3b4] sm:$0xf0]  ;;  %v3011_v10 = vor.u32 %v4190_v58, %v3008_v59  ;;  %v4346_v59 = vld [vmem:[%s6559_s1 + $0x5a4] sm:$0xf] }
  0x6d   :  { %2214 = vmatpush.bf16.msrb.mxu2 %v3263_v61  ;;  %v3215_v61 = vor.u32 %v4241_v48, %v3212_v50  ;;  %v3383_v6 = vor.u32 %v4283_v54, %v3380_v57  ;;  %v3344_v48 = vld [vmem:[%s6559_s1 + $0x36c] sm:$0xf0]  ;;  %v3647_v54 = vor.u32 %v4349_v43, %v3644_v46  ;;  %v3548_v57 = vld [vmem:[%s6559_s1 + $0x504] sm:$0xf0]  ;;  %v4262_v43 = vld [vmem:[%s6559_s1 + $0x304] sm:$0xf] }
  0x6e   :  { %2173 = vmatpush.bf16.msrb.mxu3 %v2963_v1  ;;  %v2915_v1 = vor.u32 %v4166_v51, %v2912_v53  ;;  %v4298_v53 = vld [vmem:[%s6559_s1 + $0x424] sm:$0xf]  ;;  %v3296_v46 = vld [vmem:[%s6559_s1 + $0x30c] sm:$0xf0] }
  0x6f   :  { %2200 = vmatpush.bf16.msrb.mxu1 %v3167_v9  ;;  %v3668_v9 = vld [vmem:[%s6559_s1 + $0x5f4] sm:$0xf0] }
  0x70   :  { %2187 = vmatpush.bf16.msrb.mxu0 %v3059_v7  ;;  %v4355_v7 = vld [vmem:[%s6559_s1 + $0x5ec] sm:$0xf] }
  0x71   :  { %2215 = vmatpush.bf16.msrb.mxu2 %v3251_v11  ;;  %v3119_v11 = vor.u32 %v4217_v62, %v3116_v63  ;;  %v3671_v20 = vor.u32 %v4355_v7, %v3668_v9  ;;  %v4271_v62 = vld [vmem:[%s6559_s1 + $0x34c] sm:$0xf]  ;;  %v3332_v63 = vld [vmem:[%s6559_s1 + $0x354] sm:$0xf0]  ;;  %v3536_v7 = vld [vmem:[%s6559_s1 + $0x4ec] sm:$0xf0] }
  0x72   :  { %2174 = vmatpush.bf16.msrb.mxu3 %v2951_v16  ;;  %v3479_v16 = vor.u32 %v4307_v4, %v3476_v5  ;;  %v3428_v5 = vld [vmem:[%s6559_s1 + $0x414] sm:$0xf0]  ;;  %v3335_v9 = vor.u32 %v4271_v62, %v3332_v63  ;;  %v4403_v63 = vld [vmem:[%s6559_s1 + $0x76c] sm:$0xf] }
  0x73   :  { %2201 = vmatpush.bf16.msrb.mxu1 %v3155_v22  ;;  %v4331_v22 = vld [vmem:[%s6559_s1 + $0x52c] sm:$0xf] }
  0x74   :  { %2188 = vmatpush.bf16.msrb.mxu0 %v3047_v21  ;;  %v3464_v21 = vld [vmem:[%s6559_s1 + $0x45c] sm:$0xf0]  ;;  %v3575_v32 = vor.u32 %v4331_v22, %v3572_v23  ;;  %v4340_v23 = vld [vmem:[%s6559_s1 + $0x574] sm:$0xf] }
  0x75   :  { %2216 = vmatpush.bf16.msrb.mxu2 %v3239_v24  ;;  %v3371_v24 = vor.u32 %v4280_v12, %v3368_v13  ;;  %v3467_v31 = vor.u32 %v4304_v19, %v3464_v21  ;;  %v4268_v12 = vld [vmem:[%s6559_s1 + $0x334] sm:$0xf]  ;;  %v3320_v13 = vld [vmem:[%s6559_s1 + $0x33c] sm:$0xf0]  ;;  %v3524_v21 = vld [vmem:[%s6559_s1 + $0x4d4] sm:$0xf0] }
  0x76   :  { %2175 = vmatpush.bf16.msrb.mxu3 %v2939_v29  ;;  %v4277_v29 = vld [vmem:[%s6559_s1 + $0x37c] sm:$0xf]  ;;  %v3416_v19 = vld [vmem:[%s6559_s1 + $0x3fc] sm:$0xf0]  ;;  %v3323_v22 = vor.u32 %v4268_v12, %v3320_v13  ;;  %v4400_v12 = vld [vmem:[%s6559_s1 + $0x754] sm:$0xf] }
  0x77   :  { %2202 = vmatpush.bf16.msrb.mxu1 %v3143_v37  ;;  %v3452_v37 = vld [vmem:[%s6559_s1 + $0x444] sm:$0xf0]  ;;  %v3359_v42 = vor.u32 %v4277_v29, %v3356_v30  ;;  %v4289_v30 = vld [vmem:[%s6559_s1 + $0x3dc] sm:$0xf]  ;;  %v4427_v13 = vld [vmem:[%s6559_s1 + $0x82c] sm:$0xf] }
  0x78   :  { %2189 = vmatpush.bf16.msrb.mxu0 %v3035_v34  ;;  %v3659_v34 = vor.u32 %v4352_v25, %v3656_v26  ;;  %v3455_v50 = vor.u32 %v4301_v33, %v3452_v37  ;;  %v4265_v25 = vld [vmem:[%s6559_s1 + $0x31c] sm:$0xf]  ;;  %v3308_v26 = vld [vmem:[%s6559_s1 + $0x324] sm:$0xf0]  ;;  %v4316_v33 = vld [vmem:[%s6559_s1 + $0x4b4] sm:$0xf]  ;;  %v1419_v37 = vunpack.c.h.b16 %v4903_v52 }
  0x79   :  { %2217 = vmatpush.bf16.msrb.mxu2 %v3227_v40  ;;  %v3560_v40 = vld [vmem:[%s6559_s1 + $0x51c] sm:$0xf0] }
  0x7a   :  { %2176 = vmatpush.bf16.msrb.mxu3 %v2927_v47  ;;  %v4274_v47 = vld [vmem:[%s6559_s1 + $0x364] sm:$0xf]  ;;  %v3563_v51 = vor.u32 %v4328_v39, %v3560_v40  ;;  %v3311_v39 = vor.u32 %v4265_v25, %v3308_v26  ;;  %v4337_v40 = vld [vmem:[%s6559_s1 + $0x55c] sm:$0xf] }
  0x7b   :  { %2203 = vmatpush.bf16.msrb.mxu1 %v3131_v56  ;;  %v4325_v56 = vld [vmem:[%s6559_s1 + $0x4fc] sm:$0xf]  ;;  %v3347_v58 = vor.u32 %v4274_v47, %v3344_v48  ;;  %v4379_v48 = vld [vmem:[%s6559_s1 + $0x6ac] sm:$0xf] }
  0x7c   :  { %2190 = vmatpush.bf16.msrb.mxu0 %v3023_v55  ;;  %v3440_v55 = vld [vmem:[%s6559_s1 + $0x42c] sm:$0xf0]  ;;  %v4397_v26 = vld [vmem:[%s6559_s1 + $0x73c] sm:$0xf] }
  0x7d   :  { %2218 = vmatpush.bf16.msrb.mxu2 %v3215_v61  ;;  %v3632_v61 = vld [vmem:[%s6559_s1 + $0x5ac] sm:$0xf0]  ;;  %v3443_v0 = vor.u32 %v4298_v53, %v3440_v55  ;;  %v4313_v55 = vld [vmem:[%s6559_s1 + $0x49c] sm:$0xf] }
  0x7e   :  { %2177 = vmatpush.bf16.msrb.mxu3 %v2915_v1  ;;  %v3551_v1 = vor.u32 %v4325_v56, %v3548_v57  ;;  %v3635_v4 = vor.u32 %v4346_v59, %v3632_v61  ;;  %v3500_v56 = vld [vmem:[%s6559_s1 + $0x4a4] sm:$0xf0]  ;;  %v1704_v57 = vpack.c.b16 %v1419_v37, %v1419_v37  ;;  %v4334_v59 = vld [vmem:[%s6559_s1 + $0x544] sm:$0xf]  ;;  %v3584_v61 = vld [vmem:[%s6559_s1 + $0x54c] sm:$0xf0] }
  0x7f   :  { %2204 = vmatpush.bf16.msrb.mxu1 %v3119_v11  ;;  %v3620_v11 = vld [vmem:[%s6559_s1 + $0x594] sm:$0xf0]  ;;  %v3728_v37 = vld [vmem:[%s6559_s1 + $0x66c] sm:$0xf0] }
  0x80   :  { %2191 = vmatpush.bf16.msrb.mxu0 %v3011_v10  ;;  %v4343_v10 = vld [vmem:[%s6559_s1 + $0x58c] sm:$0xf] }
  0x81   :  { %2219 = vmatpush.bf16.msrb.mxu2 %v3203_v15  ;;  %2178 = vmatmul.bf16.vlgmr.msrb.gmra.mxu3 %v4780_v60  ;;  %v3431_v15 = vor.u32 %v4295_v3, %v3428_v5  ;;  %v3623_v18 = vor.u32 %v4343_v10, %v3620_v11  ;;  %v3503_v3 = vor.u32 %v4313_v55, %v3500_v56  ;;  %v3752_v5 = vld [vmem:[%s6559_s1 + $0x69c] sm:$0xf0]  ;;  %v3488_v10 = vld [vmem:[%s6559_s1 + $0x48c] sm:$0xf0] }
  0x82   :  { %2226 = vmatpush.bf16.msra.mxu3 %v3383_v6  ;;  %v4322_v6 = vld [vmem:[%s6559_s1 + $0x4e4] sm:$0xf] }
  0x83   :  { %2192 = vmatmul.bf16.vlgmr.msrb.gmra.mxu0 %v4810_v8  ;;  %2205 = vmatpush.bf16.msrb.mxu1 %v3107_v28  ;;  %v3419_v28 = vor.u32 %v4292_v17, %v3416_v19  ;;  %v3848_v17 = vld [vmem:[%s6559_s1 + $0x75c] sm:$0xf0]  ;;  %v4028_v19 = vld [vmem:[%s6559_s1 + $0x8c4] sm:$0xf0] }
  0x84   :  { %2240 = vmatpush.bf16.msra.mxu0 %v3479_v16  ;;  %2220 = vmatmul.bf16.vlgmr.msrb.gmra.mxu2 %v4821_v14  ;;  %v3539_v16 = vor.u32 %v4322_v6, %v3536_v7  ;;  %v3587_v6 = vor.u32 %v4334_v59, %v3584_v61  ;;  %v1997_v7 = vsel %vm1992_vm0, %v1704_v57, 0  ;;  %v4418_v59 = vld [vmem:[%s6559_s1 + $0x7e4] sm:$0xf]  ;;  %v3920_v61 = vld [vmem:[%s6559_s1 + $0x7ec] sm:$0xf0] }
  0x85   :  { %2268 = vmatpush.bf16.msra.mxu2 %v3671_v20  ;;  %v4319_v20 = vld [vmem:[%s6559_s1 + $0x4cc] sm:$0xf] }
  0x86   :  { %2227 = vmatpush.bf16.msra.mxu3 %v3371_v24  ;;  %2206 = vmatmul.bf16.vlgmr.msrb.gmra.mxu1 %v4794_v2  ;;  %v3608_v24 = vld [vmem:[%s6559_s1 + $0x57c] sm:$0xf0]  ;;  %v3527_v29 = vor.u32 %v4319_v20, %v3524_v21  ;;  %v4373_v21 = vld [vmem:[%s6559_s1 + $0x67c] sm:$0xf] }
  0x87   :  { %2254 = vmatpush.bf16.msra.mxu1 %v3575_v32  ;;  %v3404_v32 = vld [vmem:[%s6559_s1 + $0x3e4] sm:$0xf0] }
  0x88   :  { %2241 = vmatpush.bf16.msra.mxu0 %v3467_v31  ;;  %v3611_v31 = vor.u32 %v4340_v23, %v3608_v24  ;;  %v3407_v52 = vor.u32 %v4289_v30, %v3404_v32  ;;  %v3851_v24 = vor.u32 %v4400_v12, %v3848_v17  ;;  %v4442_v32 = vld [vmem:[%s6559_s1 + $0x8a4] sm:$0xf]  ;;  %v3908_v12 = vld [vmem:[%s6559_s1 + $0x7d4] sm:$0xf0]  ;;  %v3980_v17 = vld [vmem:[%s6559_s1 + $0x864] sm:$0xf0] }
  0x89   :  { %2269 = vmatpush.bf16.msra.mxu2 %v3659_v34  ;;  %v3512_v34 = vld [vmem:[%s6559_s1 + $0x4bc] sm:$0xf0] }
  0x8a   :  { %2228 = vmatpush.bf16.msra.mxu3 %v3359_v42  ;;  %v3596_v42 = vld [vmem:[%s6559_s1 + $0x564] sm:$0xf0]  ;;  %v3515_v47 = vor.u32 %v4316_v33, %v3512_v34  ;;  %v4016_v33 = vld [vmem:[%s6559_s1 + $0x8ac] sm:$0xf0]  ;;  %v4370_v34 = vld [vmem:[%s6559_s1 + $0x664] sm:$0xf] }
  0x8b   :  { %2255 = vmatpush.bf16.msra.mxu1 %v3563_v51  ;;  %v4286_v51 = vld [vmem:[%s6559_s1 + $0x3c4] sm:$0xf]  ;;  %v3599_v53 = vor.u32 %v4337_v40, %v3596_v42  ;;  %v4019_v42 = vor.u32 %v4442_v32, %v4016_v33  ;;  %v3968_v33 = vld [vmem:[%s6559_s1 + $0x84c] sm:$0xf0] }
  0x8c   :  { %2242 = vmatpush.bf16.msra.mxu0 %v3455_v50  ;;  %v3764_v50 = vld [vmem:[%s6559_s1 + $0x6b4] sm:$0xf0]  ;;  %v4430_v32 = vld [vmem:[%s6559_s1 + $0x844] sm:$0xf] }
  0x8d   :  { %2270 = vmatpush.bf16.msra.mxu2 %v3647_v54  ;;  %v3392_v54 = vld [vmem:[%s6559_s1 + $0x3cc] sm:$0xf0]  ;;  %v3767_v62 = vor.u32 %v4379_v48, %v3764_v50  ;;  %v4439_v50 = vld [vmem:[%s6559_s1 + $0x88c] sm:$0xf] }
  0x8e   :  { %2229 = vmatpush.bf16.msra.mxu3 %v3347_v58  ;;  %v3299_v58 = vor.u32 %v4262_v43, %v3296_v46  ;;  %v4394_v43 = vld [vmem:[%s6559_s1 + $0x724] sm:$0xf]  ;;  %v4421_v46 = vld [vmem:[%s6559_s1 + $0x7fc] sm:$0xf]  ;;  %v3824_v48 = vld [vmem:[%s6559_s1 + $0x72c] sm:$0xf0] }
  0x8f   :  { %2256 = vmatpush.bf16.msra.mxu1 %v3551_v1  ;;  %v3395_v1 = vor.u32 %v4286_v51, %v3392_v54  ;;  %v4004_v51 = vld [vmem:[%s6559_s1 + $0x894] sm:$0xf0]  ;;  %v3827_v56 = vor.u32 %v4394_v43, %v3824_v48  ;;  %v3971_v48 = vor.u32 %v4430_v32, %v3968_v33  ;;  %v2966_v32 = vld [vmem:[%s6559_s1 + $0x68] sm:$0xf] }
  0x90   :  { %2243 = vmatpush.bf16.msra.mxu0 %v3443_v0  ;;  %v3860_v0 = vld [vmem:[%s6559_s1 + $0x774] sm:$0xf0]  ;;  %v4007_v57 = vor.u32 %v4439_v50, %v4004_v51  ;;  %v4409_v50 = vld [vmem:[%s6559_s1 + $0x79c] sm:$0xf]  ;;  %v3884_v51 = vld [vmem:[%s6559_s1 + $0x7a4] sm:$0xf0] }
  0x91   :  { %2271 = vmatpush.bf16.msra.mxu2 %v3635_v4  ;;  %v4376_v4 = vld [vmem:[%s6559_s1 + $0x694] sm:$0xf]  ;;  %v3863_v11 = vor.u32 %v4403_v63, %v3860_v0  ;;  %v3716_v54 = vld [vmem:[%s6559_s1 + $0x654] sm:$0xf0] }
  0x92   :  { %2230 = vmatpush.bf16.msra.mxu3 %v3335_v9  ;;  %v4310_v9 = vld [vmem:[%s6559_s1 + $0x484] sm:$0xf]  ;;  %v3812_v63 = vld [vmem:[%s6559_s1 + $0x714] sm:$0xf0]  ;;  %v4436_v0 = vld [vmem:[%s6559_s1 + $0x874] sm:$0xf] }
  0x93   :  { %2257 = vmatpush.bf16.msra.mxu1 %v3539_v16  ;;  %v3755_v16 = vor.u32 %v4376_v4, %v3752_v5  ;;  %v3491_v20 = vor.u32 %v4310_v9, %v3488_v10  ;;  %v3704_v4 = vld [vmem:[%s6559_s1 + $0x63c] sm:$0xf0]  ;;  %v3923_v5 = vor.u32 %v4418_v59, %v3920_v61  ;;  %v4388_v10 = vld [vmem:[%s6559_s1 + $0x6f4] sm:$0xf]  ;;  %v3278_v33 = vld [vmem:[%s6559_s1 + $0x2d8] sm:$0xf] }
  0x94   :  { %2244 = vmatpush.bf16.msra.mxu0 %v3431_v15  ;;  %v3956_v15 = vld [vmem:[%s6559_s1 + $0x834] sm:$0xf0] }
  0x95   :  { %2272 = vmatpush.bf16.msra.mxu2 %v3623_v18  ;;  %v4445_v18 = vld [vmem:[%s6559_s1 + $0x8bc] sm:$0xf]  ;;  %v3959_v23 = vor.u32 %v4427_v13, %v3956_v15  ;;  %v3800_v15 = vld [vmem:[%s6559_s1 + $0x6fc] sm:$0xf0] }
  0x96   :  { %2231 = vmatpush.bf16.msra.mxu3 %v3323_v22  ;;  %v3740_v22 = vld [vmem:[%s6559_s1 + $0x684] sm:$0xf0]  ;;  %v4031_v25 = vor.u32 %v4445_v18, %v4028_v19  ;;  %v4361_v19 = vld [vmem:[%s6559_s1 + $0x61c] sm:$0xf] }
  0x97   :  { %2258 = vmatpush.bf16.msra.mxu1 %v3527_v29  ;;  %v3944_v29 = vld [vmem:[%s6559_s1 + $0x81c] sm:$0xf0]  ;;  %v3743_v30 = vor.u32 %v4373_v21, %v3740_v22 }
  0x98   :  { %2245 = vmatpush.bf16.msra.mxu0 %v3419_v28  ;;  %v4424_v28 = vld [vmem:[%s6559_s1 + $0x814] sm:$0xf] }
  0x99   :  { %2273 = vmatpush.bf16.msra.mxu2 %v3611_v31  ;;  %v3836_v31 = vld [vmem:[%s6559_s1 + $0x744] sm:$0xf0] }
  0x9a   :  { %2232 = vmatpush.bf16.msra.mxu3 %v3311_v39  ;;  %v3947_v39 = vor.u32 %v4424_v28, %v3944_v29  ;;  %v3839_v40 = vor.u32 %v4397_v26, %v3836_v31  ;;  %v4385_v26 = vld [vmem:[%s6559_s1 + $0x6dc] sm:$0xf]  ;;  %v4412_v28 = vld [vmem:[%s6559_s1 + $0x7b4] sm:$0xf]  ;;  %v3896_v29 = vld [vmem:[%s6559_s1 + $0x7bc] sm:$0xf0] }
  0x9b   :  { %2259 = vmatpush.bf16.msra.mxu1 %v3515_v47  ;;  %v3731_v47 = vor.u32 %v4370_v34, %v3728_v37  ;;  %v3788_v31 = vld [vmem:[%s6559_s1 + $0x6e4] sm:$0xf0]  ;;  %v3680_v37 = vld [vmem:[%s6559_s1 + $0x60c] sm:$0xf0]  ;;  %v3899_v43 = vor.u32 %v4412_v28, %v3896_v29 }
  0x9c   :  { %2246 = vmatpush.bf16.msra.mxu0 %v3407_v52  ;;  %v3932_v52 = vld [vmem:[%s6559_s1 + $0x804] sm:$0xf0] }
  0x9d   :  { %2274 = vmatpush.bf16.msra.mxu2 %v3599_v53  ;;  %v4367_v53 = vld [vmem:[%s6559_s1 + $0x64c] sm:$0xf]  ;;  %v3935_v55 = vor.u32 %v4421_v46, %v3932_v52  ;;  %v3098_v46 = vld [vmem:[%s6559_s1 + $0x170] sm:$0xf]  ;;  %v4213_v52 = vld [vmem:[%s6559_s1 + $0x178] sm:$0xf0] }
  0x9e   :  { %2233 = vmatpush.bf16.msra.mxu3 %v3299_v58  ;;  %v4391_v58 = vld [vmem:[%s6559_s1 + $0x70c] sm:$0xf] }
  0x9f   :  { %2260 = vmatpush.bf16.msra.mxu1 %v3503_v3  ;;  %v4364_v3 = vld [vmem:[%s6559_s1 + $0x634] sm:$0xf] }
  0xa0   :  { %2247 = vmatpush.bf16.msra.mxu0 %v3395_v1  ;;  %v3992_v1 = vld [vmem:[%s6559_s1 + $0x87c] sm:$0xf0]  ;;  %v3707_v13 = vor.u32 %v4364_v3, %v3704_v4  ;;  %v4237_v3 = vld [vmem:[%s6559_s1 + $0x238] sm:$0xf0] }
  0xa1   :  { %2234 = vmatmul.bf16.vlgmr.msra.gmra.mxu3 %v4997_v38  ;;  %2275 = vmatpush.bf16.msra.mxu2 %v3587_v6  ;;  %v2011_v6 = vpop.f32.mrf.mxu0  ;;  %v3995_v9 = vor.u32 %v4436_v0, %v3992_v1  ;;  %v4186_v0 = vld [vmem:[%s6559_s1 + $0xa0] sm:$0xf0]  ;;  %v3194_v1 = vld [vmem:[%s6559_s1 + $0x230] sm:$0xf] }
  0xa2   :  { %2282 = vmatpush.bf16.msrb.mxu3 %v3767_v62  ;;  %v3719_v62 = vor.u32 %v4367_v53, %v3716_v54 }
  0xa3   :  { %2248 = vmatmul.bf16.vlgmr.msra.gmra.mxu0 %v5021_v49  ;;  %2261 = vmatpush.bf16.msra.mxu1 %v3491_v20  ;;  %v2025_v18 = vpop.f32.mrf.mxu1  ;;  %v3692_v20 = vld [vmem:[%s6559_s1 + $0x624] sm:$0xf0] }
  0xa4   :  { %2296 = vmatpush.bf16.msrb.mxu0 %v3863_v11  ;;  %2276 = vmatmul.bf16.vlgmr.msra.gmra.mxu2 %v5013_v45  ;;  %v4415_v11 = vld [vmem:[%s6559_s1 + $0x7cc] sm:$0xf]  ;;  %v2026_v21 = vadd.f32 %v2025_v18, %v2011_v6  ;;  %v3086_v6 = vld [vmem:[%s6559_s1 + $0x158] sm:$0xf] }
  0xa5   :  { %2325 = vmatpush.bf16.msrb.mxu2 %v1997_v7  ;;  %v3815_v7 = vor.u32 %v4391_v58, %v3812_v63  ;;  %v3911_v22 = vor.u32 %v4415_v11, %v3908_v12  ;;  %v2990_v58 = vld [vmem:[%s6559_s1 + $0x98] sm:$0xf]  ;;  %v3099_v63 = vor.u32 %v4213_v52, %v3098_v46  ;;  %v3872_v11 = vld [vmem:[%s6559_s1 + $0x78c] sm:$0xf0]  ;;  %v3062_v46 = vld [vmem:[%s6559_s1 + $0x128] sm:$0xf] }
  0xa6   :  { %2283 = vmatpush.bf16.msrb.mxu3 %v3755_v16  ;;  %2262 = vmatmul.bf16.vlgmr.msra.gmra.mxu1 %v5005_v41  ;;  %v4433_v16 = vld [vmem:[%s6559_s1 + $0x85c] sm:$0xf]  ;;  %v2991_v12 = vor.u32 %v4186_v0, %v2990_v58  ;;  %v4204_v52 = vld [vmem:[%s6559_s1 + $0x130] sm:$0xf0] }
  0xa7   :  { %2310 = vmatpush.bf16.msrb.mxu1 %v3959_v23  ;;  %v3803_v23 = vor.u32 %v4388_v10, %v3800_v15  ;;  %v2039_v34 = vpop.f32.mrf.mxu2  ;;  %v4406_v10 = vld [vmem:[%s6559_s1 + $0x784] sm:$0xf]  ;;  %v2978_v15 = vld [vmem:[%s6559_s1 + $0x80] sm:$0xf]  ;;  %v4228_v58 = vld [vmem:[%s6559_s1 + $0x1f0] sm:$0xf0] }
  0xa8   :  { %2297 = vmatpush.bf16.msrb.mxu0 %v3851_v24  ;;  %v3983_v24 = vor.u32 %v4433_v16, %v3980_v17  ;;  %v2053_v53 = vpop.f32.mrf.mxu3  ;;  %v3290_v16 = vld [vmem:[%s6559_s1 + $0x2f0] sm:$0xf]  ;;  %v4261_v17 = vld [vmem:[%s6559_s1 + $0x2f8] sm:$0xf0] }
  0xa9   :  { %2326 = vmatpush.bf16.msrb.mxu2 %v4031_v25  ;;  %v4358_v25 = vld [vmem:[%s6559_s1 + $0x604] sm:$0xf]  ;;  %v2013_v59 = vpop.f32.mrf.mxu0  ;;  %v3291_v28 = vor.u32 %v4261_v17, %v3290_v16 }
  0xaa   :  { %2284 = vmatpush.bf16.msrb.mxu3 %v3743_v30  ;;  %v3695_v30 = vor.u32 %v4361_v19, %v3692_v20  ;;  %v3683_v54 = vor.u32 %v4358_v25, %v3680_v37  ;;  %v4183_v20 = vld [vmem:[%s6559_s1 + $0x88] sm:$0xf0]  ;;  %v3074_v25 = vld [vmem:[%s6559_s1 + $0x140] sm:$0xf] }
  0xab   :  { %2311 = vmatpush.bf16.msrb.mxu1 %v3947_v39  ;;  %v3002_v39 = vld [vmem:[%s6559_s1 + $0xb0] sm:$0xf] }
  0xac   :  { %2298 = vmatpush.bf16.msrb.mxu0 %v3839_v40  ;;  %v4189_v40 = vld [vmem:[%s6559_s1 + $0xb8] sm:$0xf0] }
  0xad   :  { %2327 = vmatpush.bf16.msrb.mxu2 %v4019_v42  ;;  %v2040_v42 = vadd.f32 %v2039_v34, %v2026_v21  ;;  %v3182_v21 = vld [vmem:[%s6559_s1 + $0x218] sm:$0xf]  ;;  %v4258_v34 = vld [vmem:[%s6559_s1 + $0x2e0] sm:$0xf0] }
  0xae   :  { %2285 = vmatpush.bf16.msrb.mxu3 %v3731_v47  ;;  %v3791_v47 = vor.u32 %v4385_v26, %v3788_v31  ;;  %v4207_v26 = vld [vmem:[%s6559_s1 + $0x148] sm:$0xf0] }
  0xaf   :  { %2312 = vmatpush.bf16.msrb.mxu1 %v3935_v55  ;;  %v3003_v55 = vor.u32 %v4189_v40, %v3002_v39  ;;  %v5785_v61 = vadd.f32 %v2053_v53, %v2040_v42  ;;  %v2041_v18 = vpop.f32.mrf.mxu2  ;;  %v3075_v39 = vor.u32 %v4207_v26, %v3074_v25  ;;  %v4180_v40 = vld [vmem:[%s6559_s1 + $0x70] sm:$0xf0]  ;;  %v3170_v42 = vld [vmem:[%s6559_s1 + $0x200] sm:$0xf]  ;;  %v4222_v25 = vld [vmem:[%s6559_s1 + $0x1c0] sm:$0xf0] }
  0xb0   :  { %2299 = vmatpush.bf16.msrb.mxu0 %v3827_v56  ;;  %v4382_v56 = vld [vmem:[%s6559_s1 + $0x6c4] sm:$0xf]  ;;  %v2055_v29 = vpop.f32.mrf.mxu3  ;;  %v3266_v53 = vld [vmem:[%s6559_s1 + $0x2c0] sm:$0xf] }
  0xb1   :  { %2328 = vmatpush.bf16.msrb.mxu2 %v4007_v57  ;;  %v3776_v57 = vld [vmem:[%s6559_s1 + $0x6cc] sm:$0xf0] }
  0xb2   :  { %2286 = vmatpush.bf16.msrb.mxu3 %v3719_v62  ;;  %v2027_v62 = vpop.f32.mrf.mxu1 }
  0xb3   :  { %2313 = vmatpush.bf16.msrb.mxu1 %v3923_v5  ;;  %v2028_v4 = vadd.f32 %v2027_v62, %v2013_v59  ;;  %v3887_v5 = vor.u32 %v4409_v50, %v3884_v51  ;;  %v2954_v51 = vld [vmem:[%s6559_s1 + $0x50] sm:$0xf]  ;;  %v4201_v62 = vld [vmem:[%s6559_s1 + $0x118] sm:$0xf0] }
  0xb4   :  { %2300 = vmatpush.bf16.msrb.mxu0 %v3815_v7  ;;  %v4210_v7 = vld [vmem:[%s6559_s1 + $0x160] sm:$0xf0]  ;;  %v3050_v59 = vld [vmem:[%s6559_s1 + $0x110] sm:$0xf] }
  0xb5   :  { %2329 = vmatpush.bf16.msrb.mxu2 %v3995_v9  ;;  %v3779_v9 = vor.u32 %v4382_v56, %v3776_v57  ;;  %v3087_v19 = vor.u32 %v4210_v7, %v3086_v6  ;;  %v4177_v56 = vld [vmem:[%s6559_s1 + $0x58] sm:$0xf0]  ;;  %v3158_v57 = vld [vmem:[%s6559_s1 + $0x1e8] sm:$0xf]  ;;  %v3051_v6 = vor.u32 %v4201_v62, %v3050_v59  ;;  %v4174_v7 = vld [vmem:[%s6559_s1 + $0x40] sm:$0xf0] }
  0xb6   :  { %2287 = vmatpush.bf16.msrb.mxu3 %v3707_v13  ;;  %v3195_v13 = vor.u32 %v4237_v3, %v3194_v1  ;;  %v2955_v0 = vor.u32 %v4177_v56, %v2954_v51  ;;  %v3159_v1 = vor.u32 %v4228_v58, %v3158_v57  ;;  %v2942_v3 = vld [vmem:[%s6559_s1 + $0x38] sm:$0xf]  ;;  %v3482_v58 = vld [vmem:[%s6559_s1 + $0x470] sm:$0xf]  ;;  %v4309_v59 = vld [vmem:[%s6559_s1 + $0x478] sm:$0xf0] }
  0xb7   :  { %2314 = vmatpush.bf16.msrb.mxu1 %v3911_v22  ;;  %v4234_v22 = vld [vmem:[%s6559_s1 + $0x220] sm:$0xf0]  ;;  %v2943_v17 = vor.u32 %v4174_v7, %v2942_v3  ;;  %v4216_v7 = vld [vmem:[%s6559_s1 + $0x190] sm:$0xf0] }
  0xb8   :  { %2301 = vmatpush.bf16.msrb.mxu0 %v3803_v23  ;;  %v2042_v23 = vadd.f32 %v2041_v18, %v2028_v4  ;;  %v3183_v31 = vor.u32 %v4234_v22, %v3182_v21  ;;  %v3254_v4 = vld [vmem:[%s6559_s1 + $0x2a8] sm:$0xf]  ;;  %v4249_v21 = vld [vmem:[%s6559_s1 + $0x298] sm:$0xf0] }
  0xb9   :  { %2330 = vmatpush.bf16.msrb.mxu2 %v3983_v24  ;;  %v3875_v24 = vor.u32 %v4406_v10, %v3872_v11  ;;  %v4225_v10 = vld [vmem:[%s6559_s1 + $0x1d8] sm:$0xf0] }
  0xba   :  { %2288 = vmatpush.bf16.msrb.mxu3 %v3695_v30  ;;  %v2979_v30 = vor.u32 %v4183_v20, %v2978_v15  ;;  %v5844_v37 = vadd.f32 %v2055_v29, %v2042_v23  ;;  %v3242_v20 = vld [vmem:[%s6559_s1 + $0x290] sm:$0xf]  ;;  %v4171_v23 = vld [vmem:[%s6559_s1 + $0x28] sm:$0xf0] }
  0xbb   :  { %2315 = vmatpush.bf16.msrb.mxu1 %v3899_v43  ;;  %v4231_v43 = vld [vmem:[%s6559_s1 + $0x208] sm:$0xf0] }
  0xbc   :  { %2302 = vmatpush.bf16.msrb.mxu0 %v3791_v47  ;;  %v3279_v47 = vor.u32 %v4258_v34, %v3278_v33  ;;  %v3171_v50 = vor.u32 %v4231_v43, %v3170_v42  ;;  %v4195_v29 = vld [vmem:[%s6559_s1 + $0xe8] sm:$0xf0]  ;;  %v4168_v34 = vld [vmem:[%s6559_s1 + $0x10] sm:$0xf0] }
  0xbd   :  { %2331 = vmatpush.bf16.msrb.mxu2 %v3971_v48  ;;  %v2967_v48 = vor.u32 %v4180_v40, %v2966_v32  ;;  %v4246_v40 = vld [vmem:[%s6559_s1 + $0x280] sm:$0xf0] }
  0xbe   :  { %2289 = vmatpush.bf16.msrb.mxu3 %v3683_v54  ;;  %v4255_v54 = vld [vmem:[%s6559_s1 + $0x2c8] sm:$0xf0] }
  0xbf   :  { %2316 = vmatpush.bf16.msrb.mxu1 %v3887_v5  ;;  %v4252_v5 = vld [vmem:[%s6559_s1 + $0x2b0] sm:$0xf0] }
  0xc0   :  { %4037 = vmatmul.msk.bf16.vlgmr.msrb.gmra.mxu2 %vm1988_vm1, %v5216_v27  ;;  %2303 = vmatpush.bf16.msrb.mxu0 %v3779_v9  ;;  %v3146_v9 = vld [vmem:[%s6559_s1 + $0x1d0] sm:$0xf]  ;;  %v2067_v11 = vpop.f32.mrf.mxu0  ;;  %v3255_v16 = vor.u32 %v4252_v5, %v3254_v4 }
  0xc1   :  { %2338 = vmatpush.bf16.msra.mxu2 %v3003_v55  ;;  %2290 = vmatmul.bf16.vlgmr.msrb.gmra.mxu3 %v5233_v35  ;;  %v3063_v55 = vor.u32 %v4204_v52, %v3062_v46  ;;  %v2068_v15 = vadd.f32 %v2067_v11, %v5785_v61  ;;  %v3147_v18 = vor.u32 %v4225_v10, %v3146_v9  ;;  %v3014_v46 = vld [vmem:[%s6559_s1 + $0xc8] sm:$0xf]  ;;  %v3122_v52 = vld [vmem:[%s6559_s1 + $0x1a0] sm:$0xf]  ;;  %v3374_v9 = vld [vmem:[%s6559_s1 + $0x398] sm:$0xf] }
  0xc2   :  { %2352 = vmatpush.bf16.msra.mxu3 %v3099_v63  ;;  %v3267_v63 = vor.u32 %v4255_v54, %v3266_v53  ;;  %v4192_v53 = vld [vmem:[%s6559_s1 + $0xd0] sm:$0xf0]  ;;  %v3386_v54 = vld [vmem:[%s6559_s1 + $0x3b0] sm:$0xf]  ;;  %v3483_v11 = vor.u32 %v4309_v59, %v3482_v58 }
  0xc3   :  { %2317 = vmatpush.bf16.msrb.mxu1 %v3875_v24  ;;  %2304 = vmatmul.bf16.vlgmr.msrb.gmra.mxu0 %v5246_v44  ;;  %v2081_v61 = vpop.f32.mrf.mxu1  ;;  %v3134_v24 = vld [vmem:[%s6559_s1 + $0x1b8] sm:$0xf]  ;;  %v3015_v4 = vor.u32 %v4192_v53, %v3014_v46  ;;  %v4327_v53 = vld [vmem:[%s6559_s1 + $0x508] sm:$0xf0]  ;;  %v3338_v59 = vld [vmem:[%s6559_s1 + $0x350] sm:$0xf] }
  0xc4   :  { %2366 = vmatpush.bf16.msra.mxu0 %v3195_v13  ;;  %v4198_v13 = vld [vmem:[%s6559_s1 + $0x100] sm:$0xf0]  ;;  %v2082_v26 = vadd.f32 %v2081_v61, %v2068_v15  ;;  %v3135_v33 = vor.u32 %v4222_v25, %v3134_v24  ;;  %v4333_v15 = vld [vmem:[%s6559_s1 + $0x538] sm:$0xf0]  ;;  %v3362_v24 = vld [vmem:[%s6559_s1 + $0x380] sm:$0xf] }
  0xc5   :  { %2339 = vmatpush.bf16.msra.mxu2 %v2991_v12  ;;  %v3038_v12 = vld [vmem:[%s6559_s1 + $0xf8] sm:$0xf]  ;;  %v3674_v25 = vld [vmem:[%s6559_s1 + $0x5f0] sm:$0xf] }
  0xc6   :  { %2353 = vmatpush.bf16.msra.mxu3 %v3087_v19  ;;  %2318 = vmatmul.bf16.vlgmr.msrb.gmra.mxu1 %v5235_v36  ;;  %v2930_v19 = vld [vmem:[%s6559_s1 + $0x20] sm:$0xf]  ;;  %v3039_v22 = vor.u32 %v4198_v13, %v3038_v12  ;;  %v4282_v12 = vld [vmem:[%s6559_s1 + $0x3a0] sm:$0xf0]  ;;  %v3578_v13 = vld [vmem:[%s6559_s1 + $0x530] sm:$0xf] }
  0xc7   :  { %2380 = vmatpush.bf16.msra.mxu1 %v3291_v28  ;;  %v3026_v28 = vld [vmem:[%s6559_s1 + $0xe0] sm:$0xf]  ;;  %v2931_v32 = vor.u32 %v4171_v23, %v2930_v19  ;;  %v2095_v42 = vpop.f32.mrf.mxu2  ;;  %v3579_v23 = vor.u32 %v4333_v15, %v3578_v13  ;;  %v4270_v13 = vld [vmem:[%s6559_s1 + $0x340] sm:$0xf0]  ;;  %v3530_v15 = vld [vmem:[%s6559_s1 + $0x4d0] sm:$0xf] }
  0xc8   :  { %2367 = vmatpush.bf16.msra.mxu0 %v3183_v31  ;;  %v2918_v31 = vld [vmem:[%s6559_s1 + $0x8] sm:$0xf]  ;;  %v3027_v43 = vor.u32 %v4195_v29, %v3026_v28  ;;  %v2109_v51 = vpop.f32.mrf.mxu3 }
  0xc9   :  { %2340 = vmatpush.bf16.msra.mxu2 %v2979_v30  ;;  %v3243_v30 = vor.u32 %v4249_v21, %v3242_v20  ;;  %v3206_v20 = vld [vmem:[%s6559_s1 + $0x248] sm:$0xf]  ;;  %v4240_v21 = vld [vmem:[%s6559_s1 + $0x250] sm:$0xf0] }
  0xca   :  { %2354 = vmatpush.bf16.msra.mxu3 %v3075_v39  ;;  %v3230_v39 = vld [vmem:[%s6559_s1 + $0x278] sm:$0xf] }
  0xcb   :  { %2381 = vmatpush.bf16.msra.mxu1 %v3279_v47  ;;  %v4219_v47 = vld [vmem:[%s6559_s1 + $0x1a8] sm:$0xf0]  ;;  %v3231_v57 = vor.u32 %v4246_v40, %v3230_v39  ;;  %v2083_v3 = vpop.f32.mrf.mxu1  ;;  %v3458_v39 = vld [vmem:[%s6559_s1 + $0x440] sm:$0xf] }
  0xcc   :  { %2368 = vmatpush.bf16.msra.mxu0 %v3171_v50  ;;  %v2069_v50 = vpop.f32.mrf.mxu0  ;;  %v4303_v40 = vld [vmem:[%s6559_s1 + $0x448] sm:$0xf0] }
  0xcd   :  { %2341 = vmatpush.bf16.msra.mxu2 %v2967_v48  ;;  %v2096_v48 = vadd.f32 %v2095_v42, %v2082_v26  ;;  %v2070_v56 = vadd.f32 %v2069_v50, %v5844_v37  ;;  %v3218_v37 = vld [vmem:[%s6559_s1 + $0x260] sm:$0xf]  ;;  %v4357_v26 = vld [vmem:[%s6559_s1 + $0x5f8] sm:$0xf0]  ;;  %v3459_v50 = vor.u32 %v4303_v40, %v3458_v39  ;;  %v3302_v40 = vld [vmem:[%s6559_s1 + $0x308] sm:$0xf] }
  0xce   :  { %2355 = vmatpush.bf16.msra.mxu3 %v3063_v55  ;;  %v4285_v55 = vld [vmem:[%s6559_s1 + $0x3b8] sm:$0xf0] }
  0xcf   :  { %2382 = vmatpush.bf16.msra.mxu1 %v3267_v63  ;;  %v5973_v62 = vadd.f32 %v2109_v51, %v2096_v48  ;;  %v2919_v63 = vor.u32 %v4168_v34, %v2918_v31  ;;  %v3387_v5 = vor.u32 %v4285_v55, %v3386_v54  ;;  %v2084_v10 = vadd.f32 %v2083_v3, %v2070_v56  ;;  %v2097_v61 = vpop.f32.mrf.mxu2  ;;  %v4279_v31 = vld [vmem:[%s6559_s1 + $0x388] sm:$0xf0]  ;;  %v3662_v48 = vld [vmem:[%s6559_s1 + $0x5d8] sm:$0xf]  ;;  %v3554_v51 = vld [vmem:[%s6559_s1 + $0x500] sm:$0xf] }
  0xd0   :  { %2369 = vmatpush.bf16.msra.mxu0 %v3159_v1  ;;  %v4243_v1 = vld [vmem:[%s6559_s1 + $0x268] sm:$0xf0]  ;;  %v2111_v29 = vpop.f32.mrf.mxu3  ;;  %v3207_v34 = vor.u32 %v4240_v21, %v3206_v20  ;;  %v3363_v46 = vor.u32 %v4279_v31, %v3362_v24  ;;  %v3446_v54 = vld [vmem:[%s6559_s1 + $0x428] sm:$0xf]  ;;  %v4300_v55 = vld [vmem:[%s6559_s1 + $0x430] sm:$0xf0]  ;;  %v3555_v58 = vor.u32 %v4327_v53, %v3554_v51 }
  0xd1   :  { %2342 = vmatpush.bf16.msra.mxu2 %v2955_v0  ;;  %v3123_v0 = vor.u32 %v4219_v47, %v3122_v52  ;;  %v2098_v28 = vadd.f32 %v2097_v61, %v2084_v10  ;;  %v3350_v47 = vld [vmem:[%s6559_s1 + $0x368] sm:$0xf]  ;;  %v4324_v3 = vld [vmem:[%s6559_s1 + $0x4f0] sm:$0xf0]  ;;  %v3326_v10 = vld [vmem:[%s6559_s1 + $0x338] sm:$0xf] }
  0xd2   :  { %2356 = vmatpush.bf16.msra.mxu3 %v3051_v6  ;;  %v3110_v6 = vld [vmem:[%s6559_s1 + $0x188] sm:$0xf]  ;;  %v3327_v61 = vor.u32 %v4270_v13, %v3326_v10  ;;  %v3626_v24 = vld [vmem:[%s6559_s1 + $0x590] sm:$0xf]  ;;  %v3506_v51 = vld [vmem:[%s6559_s1 + $0x4a0] sm:$0xf] }
  0xd3   :  { %2383 = vmatpush.bf16.msra.mxu1 %v3255_v16  ;;  %v3219_v16 = vor.u32 %v4243_v1, %v3218_v37  ;;  %v3111_v19 = vor.u32 %v4216_v7, %v3110_v6  ;;  %v6036_v42 = vadd.f32 %v2111_v29, %v2098_v28  ;;  %v4273_v37 = vld [vmem:[%s6559_s1 + $0x358] sm:$0xf0]  ;;  %v3542_v1 = vld [vmem:[%s6559_s1 + $0x4e8] sm:$0xf]  ;;  %v3518_v29 = vld [vmem:[%s6559_s1 + $0x4b8] sm:$0xf] }
  0xd4   :  { %2370 = vmatpush.bf16.msra.mxu0 %v3147_v18  ;;  %v4306_v18 = vld [vmem:[%s6559_s1 + $0x460] sm:$0xf0]  ;;  %v3339_v7 = vor.u32 %v4273_v37, %v3338_v59  ;;  %v4315_v53 = vld [vmem:[%s6559_s1 + $0x4a8] sm:$0xf0]  ;;  %v4405_v37 = vld [vmem:[%s6559_s1 + $0x778] sm:$0xf0] }
  0xd5   :  { %2343 = vmatpush.bf16.msra.mxu2 %v2943_v17  ;;  %v3470_v17 = vld [vmem:[%s6559_s1 + $0x458] sm:$0xf] }
  0xd6   :  { %2357 = vmatpush.bf16.msra.mxu3 %v3039_v22  ;;  %v3375_v22 = vor.u32 %v4282_v12, %v3374_v9  ;;  %v3543_v9 = vor.u32 %v4324_v3, %v3542_v1 }
  0xd7   :  { %2384 = vmatpush.bf16.msra.mxu1 %v3243_v30  ;;  %v3471_v30 = vor.u32 %v4306_v18, %v3470_v17  ;;  %v3422_v17 = vld [vmem:[%s6559_s1 + $0x3f8] sm:$0xf]  ;;  %v4294_v18 = vld [vmem:[%s6559_s1 + $0x400] sm:$0xf0] }
  0xd8   :  { %2371 = vmatpush.bf16.msra.mxu0 %v3135_v33  ;;  %v4330_v33 = vld [vmem:[%s6559_s1 + $0x520] sm:$0xf0]  ;;  %v3423_v28 = vor.u32 %v4294_v18, %v3422_v17  ;;  %v3962_v17 = vld [vmem:[%s6559_s1 + $0x830] sm:$0xf]  ;;  %v4429_v18 = vld [vmem:[%s6559_s1 + $0x838] sm:$0xf0] }
  0xd9   :  { %2344 = vmatpush.bf16.msra.mxu2 %v2931_v32  ;;  %v3566_v32 = vld [vmem:[%s6559_s1 + $0x518] sm:$0xf] }
  0xda   :  { %2358 = vmatpush.bf16.msra.mxu3 %v3027_v43  ;;  %v3675_v43 = vor.u32 %v4357_v26, %v3674_v25  ;;  %v3567_v52 = vor.u32 %v4330_v33, %v3566_v32  ;;  %v4345_v25 = vld [vmem:[%s6559_s1 + $0x598] sm:$0xf0]  ;;  %v3410_v32 = vld [vmem:[%s6559_s1 + $0x3e0] sm:$0xf]  ;;  %v4291_v33 = vld [vmem:[%s6559_s1 + $0x3e8] sm:$0xf0] }
  0xdb   :  { %2385 = vmatpush.bf16.msra.mxu1 %v3231_v57  ;;  %v3627_v39 = vor.u32 %v4345_v25, %v3626_v24 }
  0xdc   :  { %2372 = vmatpush.bf16.msra.mxu0 %v3123_v0  ;;  %v4351_v0 = vld [vmem:[%s6559_s1 + $0x5c8] sm:$0xf0] }
  0xdd   :  { %2345 = vmatpush.bf16.msra.mxu2 %v2919_v63  ;;  %v3650_v63 = vld [vmem:[%s6559_s1 + $0x5c0] sm:$0xf] }
  0xde   :  { %2359 = vmatpush.bf16.msra.mxu3 %v3015_v4  ;;  %v3434_v4 = vld [vmem:[%s6559_s1 + $0x410] sm:$0xf]  ;;  %v3651_v6 = vor.u32 %v4351_v0, %v3650_v63 }
  0xdf   :  { %2386 = vmatpush.bf16.msra.mxu1 %v3219_v16  ;;  %v4321_v16 = vld [vmem:[%s6559_s1 + $0x4d8] sm:$0xf0] }
  0xe0   :  { %2346 = vmatmul.bf16.vlgmr.msra.gmra.mxu2 %v4780_v60  ;;  %2373 = vmatpush.bf16.msra.mxu0 %v3111_v19  ;;  %v4354_v60 = vld [vmem:[%s6559_s1 + $0x5e0] sm:$0xf0]  ;;  %v2123_v19 = vpop.f32.mrf.mxu0 }
  0xe1   :  { %2394 = vmatpush.bf16.msrb.mxu2 %v3387_v5  ;;  %2360 = vmatmul.bf16.vlgmr.msra.gmra.mxu3 %v4810_v8  ;;  %v4276_v8 = vld [vmem:[%s6559_s1 + $0x370] sm:$0xf0]  ;;  %v3663_v56 = vor.u32 %v4354_v60, %v3662_v48  ;;  %v4297_v5 = vld [vmem:[%s6559_s1 + $0x418] sm:$0xf0]  ;;  %v2124_v21 = vadd.f32 %v2123_v19, %v5973_v62  ;;  %v4267_v62 = vld [vmem:[%s6559_s1 + $0x328] sm:$0xf0] }
  0xe2   :  { %2408 = vmatpush.bf16.msrb.mxu3 %v3483_v11  ;;  %v3351_v57 = vor.u32 %v4276_v8, %v3350_v47  ;;  %v4348_v11 = vld [vmem:[%s6559_s1 + $0x5b0] sm:$0xf0]  ;;  %v3435_v12 = vor.u32 %v4297_v5, %v3434_v4  ;;  %v3398_v47 = vld [vmem:[%s6559_s1 + $0x3c8] sm:$0xf]  ;;  %v3614_v48 = vld [vmem:[%s6559_s1 + $0x578] sm:$0xf]  ;;  %v3411_v8 = vor.u32 %v4291_v33, %v3410_v32  ;;  %v3507_v4 = vor.u32 %v4315_v53, %v3506_v51 }
  0xe3   :  { %2387 = vmatpush.bf16.msra.mxu1 %v3207_v34  ;;  %2374 = vmatmul.bf16.vlgmr.msra.gmra.mxu0 %v4794_v2  ;;  %v3447_v2 = vor.u32 %v4300_v55, %v3446_v54  ;;  %v2137_v26 = vpop.f32.mrf.mxu1  ;;  %v4342_v60 = vld [vmem:[%s6559_s1 + $0x580] sm:$0xf0]  ;;  %v416_v54 = vld [vmem:[%s6559_s1 + $0x8d8] sm:$0xf]  ;;  %v3602_v5 = vld [vmem:[%s6559_s1 + $0x560] sm:$0xf] }
  0xe4   :  { %2422 = vmatpush.bf16.msrb.mxu0 %v3579_v23  ;;  %v3314_v23 = vld [vmem:[%s6559_s1 + $0x320] sm:$0xf]  ;;  %v2138_v31 = vadd.f32 %v2137_v26, %v2124_v21  ;;  %v2165_v34 = vpop.f32.mrf.mxu3  ;;  %v3615_v0 = vor.u32 %v4342_v60, %v3614_v48  ;;  %v4402_v21 = vld [vmem:[%s6559_s1 + $0x760] sm:$0xf0]  ;;  %v4375_v32 = vld [vmem:[%s6559_s1 + $0x688] sm:$0xf0] }
  0xe5   :  { %2395 = vmatpush.bf16.msrb.mxu2 %v3375_v22  ;;  %v3531_v22 = vor.u32 %v4321_v16, %v3530_v15  ;;  %v4378_v16 = vld [vmem:[%s6559_s1 + $0x6a0] sm:$0xf0]  ;;  %v3950_v33 = vld [vmem:[%s6559_s1 + $0x818] sm:$0xf]  ;;  %v3734_v48 = vld [vmem:[%s6559_s1 + $0x668] sm:$0xf] }
  0xe6   :  { %2409 = vmatpush.bf16.msrb.mxu3 %v3471_v30  ;;  %2388 = vmatmul.bf16.vlgmr.msra.gmra.mxu1 %v4821_v14  ;;  %v3638_v14 = vld [vmem:[%s6559_s1 + $0x5a8] sm:$0xf]  ;;  %v4318_v30 = vld [vmem:[%s6559_s1 + $0x4c0] sm:$0xf0]  ;;  %v4034_v60 = vld [vmem:[%s6559_s1 + $0x8c0] sm:$0xf] }
  0xe7   :  { %2436 = vmatpush.bf16.msrb.mxu1 %v3675_v43  ;;  %v3639_v20 = vor.u32 %v4348_v11, %v3638_v14  ;;  %v4264_v43 = vld [vmem:[%s6559_s1 + $0x310] sm:$0xf0]  ;;  %v3938_v51 = vld [vmem:[%s6559_s1 + $0x800] sm:$0xf]  ;;  %v4423_v53 = vld [vmem:[%s6559_s1 + $0x808] sm:$0xf0] }
  0xe8   :  { %2423 = vmatpush.bf16.msrb.mxu0 %v3567_v52  ;;  %v3519_v52 = vor.u32 %v4318_v30, %v3518_v29  ;;  %v2125_v59 = vpop.f32.mrf.mxu0  ;;  %v3303_v63 = vor.u32 %v4264_v43, %v3302_v40  ;;  %v4312_v11 = vld [vmem:[%s6559_s1 + $0x490] sm:$0xf0]  ;;  %v3746_v29 = vld [vmem:[%s6559_s1 + $0x680] sm:$0xf]  ;;  %v4399_v43 = vld [vmem:[%s6559_s1 + $0x748] sm:$0xf0] }
  0xe9   :  { %2396 = vmatpush.bf16.msrb.mxu2 %v3363_v46  ;;  %v3315_v46 = vor.u32 %v4267_v62, %v3314_v23  ;;  %v2126_v1 = vadd.f32 %v2125_v59, %v6036_v42  ;;  %v3494_v42 = vld [vmem:[%s6559_s1 + $0x488] sm:$0xf]  ;;  %v4336_v23 = vld [vmem:[%s6559_s1 + $0x550] sm:$0xf0]  ;;  %v3963_v62 = vor.u32 %v4429_v18, %v3962_v17  ;;  %v3842_v40 = vld [vmem:[%s6559_s1 + $0x740] sm:$0xf] }
  0xea   :  { %2410 = vmatpush.bf16.msrb.mxu3 %v3459_v50  ;;  %v2151_v50 = vpop.f32.mrf.mxu2  ;;  %v3722_v59 = vld [vmem:[%s6559_s1 + $0x650] sm:$0xf] }
  0xeb   :  { %2437 = vmatpush.bf16.msrb.mxu1 %v3663_v56  ;;  %v2152_v55 = vadd.f32 %v2151_v50, %v2138_v31  ;;  %v4288_v56 = vld [vmem:[%s6559_s1 + $0x3d0] sm:$0xf0]  ;;  %v4447_v50 = vld [vmem:[%s6559_s1 + $0x8c8] sm:$0xf0] }
  0xec   :  { %2424 = vmatpush.bf16.msrb.mxu0 %v3555_v58  ;;  %v4381_v58 = vld [vmem:[%s6559_s1 + $0x6b8] sm:$0xf0]  ;;  %v3399_v10 = vor.u32 %v4288_v56, %v3398_v47  ;;  %v2167_v26 = vpop.f32.mrf.mxu3  ;;  %v4035_v56 = vor.u32 %v4447_v50, %v4034_v60  ;;  %v3974_v50 = vld [vmem:[%s6559_s1 + $0x848] sm:$0xf] }
  0xed   :  { %2397 = vmatpush.bf16.msrb.mxu2 %v3351_v57  ;;  %v3770_v57 = vld [vmem:[%s6559_s1 + $0x6b0] sm:$0xf]  ;;  %v6178_v3 = vadd.f32 %v2165_v34, %v2152_v55  ;;  %v4426_v34 = vld [vmem:[%s6559_s1 + $0x820] sm:$0xf0]  ;;  %v4396_v55 = vld [vmem:[%s6559_s1 + $0x730] sm:$0xf0] }
  0xee   :  { %2411 = vmatpush.bf16.msrb.mxu3 %v3447_v2  ;;  %v3866_v2 = vld [vmem:[%s6559_s1 + $0x770] sm:$0xf]  ;;  %v3771_v14 = vor.u32 %v4381_v58, %v3770_v57  ;;  %v3951_v47 = vor.u32 %v4426_v34, %v3950_v33  ;;  %v3939_v58 = vor.u32 %v4423_v53, %v3938_v51  ;;  %v4435_v33 = vld [vmem:[%s6559_s1 + $0x868] sm:$0xf0]  ;;  %v3878_v51 = vld [vmem:[%s6559_s1 + $0x788] sm:$0xf] }
  0xef   :  { %2438 = vmatpush.bf16.msrb.mxu1 %v3651_v6  ;;  %v4339_v6 = vld [vmem:[%s6559_s1 + $0x568] sm:$0xf0]  ;;  %v3867_v15 = vor.u32 %v4405_v37, %v3866_v2  ;;  %v4369_v2 = vld [vmem:[%s6559_s1 + $0x658] sm:$0xf0]  ;;  %v3926_v37 = vld [vmem:[%s6559_s1 + $0x7e8] sm:$0xf] }
  0xf0   :  { %2425 = vmatpush.bf16.msrb.mxu0 %v3543_v9  ;;  %v2139_v9 = vpop.f32.mrf.mxu1  ;;  %v3603_v19 = vor.u32 %v4339_v6, %v3602_v5  ;;  %v3723_v6 = vor.u32 %v4369_v2, %v3722_v59  ;;  %v4408_v53 = vld [vmem:[%s6559_s1 + $0x790] sm:$0xf0] }
  0xf1   :  { %2398 = vmatpush.bf16.msrb.mxu2 %v3339_v7  ;;  %v1420_v7 = vunpack.c.l.b16 %v416_v54  ;;  %v2140_v13 = vadd.f32 %v2139_v9, %v2126_v1  ;;  %v3830_v54 = vld [vmem:[%s6559_s1 + $0x728] sm:$0xf]  ;;  %v4420_v1 = vld [vmem:[%s6559_s1 + $0x7f0] sm:$0xf0]  ;;  %v3710_v9 = vld [vmem:[%s6559_s1 + $0x638] sm:$0xf] }
  0xf2   :  { %2412 = vmatpush.bf16.msrb.mxu3 %v3435_v12  ;;  %v3758_v12 = vld [vmem:[%s6559_s1 + $0x698] sm:$0xf]  ;;  %v2153_v25 = vpop.f32.mrf.mxu2 }
  0xf3   :  { %2439 = vmatpush.bf16.msrb.mxu1 %v3639_v20  ;;  %v3854_v20 = vld [vmem:[%s6559_s1 + $0x758] sm:$0xf]  ;;  %v1705_v24 = vpack.c.b16 %v1420_v7, %v1420_v7  ;;  %v2154_v30 = vadd.f32 %v2153_v25, %v2140_v13  ;;  %v3927_v7 = vor.u32 %v4420_v1, %v3926_v37  ;;  %v4417_v13 = vld [vmem:[%s6559_s1 + $0x7d8] sm:$0xf0]  ;;  %v4414_v25 = vld [vmem:[%s6559_s1 + $0x7c0] sm:$0xf0] }
  0xf4   :  { %2426 = vmatpush.bf16.msrb.mxu0 %v3531_v22  ;;  %v3590_v22 = vld [vmem:[%s6559_s1 + $0x548] sm:$0xf]  ;;  %v3855_v31 = vor.u32 %v4402_v21, %v3854_v20  ;;  %v3698_v20 = vld [vmem:[%s6559_s1 + $0x620] sm:$0xf]  ;;  %v3998_v21 = vld [vmem:[%s6559_s1 + $0x878] sm:$0xf] }
  0xf5   :  { %2399 = vmatpush.bf16.msrb.mxu2 %v3327_v61  ;;  %v3495_v61 = vor.u32 %v4312_v11, %v3494_v42  ;;  %v4366_v11 = vld [vmem:[%s6559_s1 + $0x640] sm:$0xf0] }
  0xf6   :  { %2413 = vmatpush.bf16.msrb.mxu3 %v3423_v28  ;;  %v3759_v28 = vor.u32 %v4378_v16, %v3758_v12  ;;  %v3914_v12 = vld [vmem:[%s6559_s1 + $0x7d0] sm:$0xf]  ;;  %v4390_v16 = vld [vmem:[%s6559_s1 + $0x700] sm:$0xf0]  ;;  %v3711_v18 = vor.u32 %v4366_v11, %v3710_v9 }
  0xf7   :  { %2440 = vmatpush.bf16.msrb.mxu1 %v3627_v39  ;;  %v3591_v39 = vor.u32 %v4336_v23, %v3590_v22  ;;  %v4363_v23 = vld [vmem:[%s6559_s1 + $0x628] sm:$0xf0] }
  0xf8   :  { %2427 = vmatpush.bf16.msrb.mxu0 %v3519_v52  ;;  %v2000_v52 = vsel %vm1992_vm0, %v1705_v24, 0  ;;  %v3902_v24 = vld [vmem:[%s6559_s1 + $0x7b8] sm:$0xf] }
  0xf9   :  { %2400 = vmatpush.bf16.msrb.mxu2 %v3315_v46  ;;  %v6235_v46 = vadd.f32 %v2167_v26, %v2154_v30  ;;  %v3794_v26 = vld [vmem:[%s6559_s1 + $0x6e0] sm:$0xf]  ;;  %v3903_v30 = vor.u32 %v4414_v25, %v3902_v24 }
  0xfa   :  { %2414 = vmatpush.bf16.msrb.mxu3 %v3411_v8  ;;  %v4372_v8 = vld [vmem:[%s6559_s1 + $0x670] sm:$0xf0] }
  0xfb   :  { %2441 = vmatpush.bf16.msrb.mxu1 %v3615_v0  ;;  %v3735_v57 = vor.u32 %v4372_v8, %v3734_v48  ;;  %v3831_v0 = vor.u32 %v4396_v55, %v3830_v54  ;;  %v3879_v55 = vor.u32 %v4408_v53, %v3878_v51 }
  0xfc   :  { %2428 = vmatpush.bf16.msrb.mxu0 %v3507_v4  ;;  %v3818_v4 = vld [vmem:[%s6559_s1 + $0x710] sm:$0xf] }
  0xfd   :  { %2401 = vmatpush.bf16.msrb.mxu2 %v3303_v63  ;;  %v4444_v63 = vld [vmem:[%s6559_s1 + $0x8b0] sm:$0xf0] }
  0xfe   :  { %2415 = vmatpush.bf16.msrb.mxu3 %v3399_v10  ;;  %v4010_v10 = vld [vmem:[%s6559_s1 + $0x890] sm:$0xf] }
  0xff   :  { %2442 = vmatpush.bf16.msrb.mxu1 %v3603_v19  ;;  %v3915_v19 = vor.u32 %v4417_v13, %v3914_v12 }
 0x100   :  { %2402 = vmatmul.bf16.vlgmr.msrb.gmra.mxu2 %v4997_v38  ;;  %2429 = vmatpush.bf16.msrb.mxu0 %v3495_v61  ;;  %v3747_v38 = vor.u32 %v4375_v32, %v3746_v29  ;;  %v4438_v61 = vld [vmem:[%s6559_s1 + $0x880] sm:$0xf0]  ;;  %v3699_v29 = vor.u32 %v4363_v23, %v3698_v20  ;;  %v3986_v32 = vld [vmem:[%s6559_s1 + $0x860] sm:$0xf] }
 0x101   :  { %2450 = vmatpush.bf16.msra.mxu2 %v3771_v14  ;;  %2416 = vmatmul.bf16.vlgmr.msrb.gmra.mxu3 %v5021_v49  ;;  %v3843_v49 = vor.u32 %v4399_v43, %v3842_v40  ;;  %v4441_v14 = vld [vmem:[%s6559_s1 + $0x898] sm:$0xf0]  ;;  %v3890_v40 = vld [vmem:[%s6559_s1 + $0x7a0] sm:$0xf]  ;;  %v4411_v43 = vld [vmem:[%s6559_s1 + $0x7a8] sm:$0xf0] }
 0x102   :  { %2464 = vmatpush.bf16.msra.mxu3 %v3867_v15  ;;  %v3806_v15 = vld [vmem:[%s6559_s1 + $0x6f8] sm:$0xf]  ;;  %v4011_v17 = vor.u32 %v4441_v14, %v4010_v10  ;;  %v3891_v60 = vor.u32 %v4411_v43, %v3890_v40 }
 0x103   :  { %2443 = vmatpush.bf16.msrb.mxu1 %v3591_v39  ;;  %2430 = vmatmul.bf16.vlgmr.msrb.gmra.mxu0 %v5005_v41  ;;  %v4022_v41 = vld [vmem:[%s6559_s1 + $0x8a8] sm:$0xf]  ;;  %v3807_v22 = vor.u32 %v4390_v16, %v3806_v15  ;;  %v4360_v39 = vld [vmem:[%s6559_s1 + $0x610] sm:$0xf0] }
 0x104   :  { %2478 = vmatpush.bf16.msra.mxu0 %v3963_v62  ;;  %v4023_v5 = vor.u32 %v4444_v63, %v4022_v41  ;;  %v3999_v62 = vor.u32 %v4438_v61, %v3998_v21 }
 0x105   :  { %2451 = vmatpush.bf16.msra.mxu2 %v3759_v28  ;;  %v4387_v28 = vld [vmem:[%s6559_s1 + $0x6e8] sm:$0xf0] }
 0x106   :  { %2465 = vmatpush.bf16.msra.mxu3 %v3855_v31  ;;  %2444 = vmatmul.bf16.vlgmr.msrb.gmra.mxu1 %v5013_v45  ;;  %v4393_v45 = vld [vmem:[%s6559_s1 + $0x718] sm:$0xf0]  ;;  %v3686_v31 = vld [vmem:[%s6559_s1 + $0x608] sm:$0xf]  ;;  %v3795_v34 = vor.u32 %v4387_v28, %v3794_v26 }
 0x107   :  { %2493 = vmatpush.bf16.msra.mxu1 %v2000_v52  ;;  %v3819_v42 = vor.u32 %v4393_v45, %v3818_v4  ;;  %v3782_v52 = vld [vmem:[%s6559_s1 + $0x6c8] sm:$0xf]  ;;  %v3687_v48 = vor.u32 %v4360_v39, %v3686_v31  ;;  %v2221_v59 = vpop.f32.mrf.mxu2 }
 0x108   :  { %2479 = vmatpush.bf16.msra.mxu0 %v3951_v47  ;;  %v3987_v47 = vor.u32 %v4435_v33, %v3986_v32 }
 0x109   :  { %2452 = vmatpush.bf16.msra.mxu2 %v3747_v38  ;;  %v4384_v38 = vld [vmem:[%s6559_s1 + $0x6d0] sm:$0xf0] }
 0x10a   :  { %2466 = vmatpush.bf16.msra.mxu3 %v3843_v49  ;;  %v4432_v49 = vld [vmem:[%s6559_s1 + $0x850] sm:$0xf0]  ;;  %v3783_v8 = vor.u32 %v4384_v38, %v3782_v52  ;;  %s4480_s1 = smov 88  }
 0x10b   :  { %2494 = vmatpush.bf16.msra.mxu1 %v4035_v56  ;;  %v3975_v54 = vor.u32 %v4432_v49, %v3974_v50  ;;  %v2193_v56 = vpop.f32.mrf.mxu0 }
 0x10c   :  { %2480 = vmatpush.bf16.msra.mxu0 %v3939_v58  ;;  %v2207_v58 = vpop.f32.mrf.mxu1 }
 0x10d   :  { %2453 = vmatpush.bf16.msra.mxu2 %v3735_v57  ;;  %v2179_v57 = vpop.f32.mrf.mxu3 }
 0x10e   :  { %2467 = vmatpush.bf16.msra.mxu3 %v3831_v0  ;;  %v2194_v37 = vadd.f32 %v2193_v56, %v2179_v57 }
 0x10f   :  { %2495 = vmatpush.bf16.msra.mxu1 %v4023_v5  ;;  %v2223_v2 = vpop.f32.mrf.mxu2 }
 0x110   :  { %2481 = vmatpush.bf16.msra.mxu0 %v3927_v7  ;;  %v2208_v1 = vadd.f32 %v2207_v58, %v2194_v37 }
 0x111   :  { %2454 = vmatpush.bf16.msra.mxu2 %v3723_v6 }
 0x112   :  { %2468 = vmatpush.bf16.msra.mxu3 %v3819_v42 }
 0x113   :  { %2496 = vmatpush.bf16.msra.mxu1 %v4011_v17  ;;  %v2195_v41 = vpop.f32.mrf.mxu0 }
 0x114   :  { %2482 = vmatpush.bf16.msra.mxu0 %v3915_v19  ;;  %v2209_v0 = vpop.f32.mrf.mxu1 }
 0x115   :  { %2455 = vmatpush.bf16.msra.mxu2 %v3711_v18  ;;  %v2181_v63 = vpop.f32.mrf.mxu3 }
 0x116   :  { %2469 = vmatpush.bf16.msra.mxu3 %v3807_v22  ;;  %v2196_v6 = vadd.f32 %v2195_v41, %v2181_v63 }
 0x117   :  { %2497 = vmatpush.bf16.msra.mxu1 %v3999_v62 }
 0x118   :  { %2483 = vmatpush.bf16.msra.mxu0 %v3903_v30 }
 0x119   :  { %2456 = vmatpush.bf16.msra.mxu2 %v3699_v29 }
 0x11a   :  { %2470 = vmatpush.bf16.msra.mxu3 %v3795_v34 }
 0x11b   :  { %2498 = vmatpush.bf16.msra.mxu1 %v3987_v47 }
 0x11c   :  { %2484 = vmatpush.bf16.msra.mxu0 %v3891_v60 }
 0x11d   :  { %2457 = vmatpush.bf16.msra.mxu2 %v3687_v48 }
 0x11e   :  { %2471 = vmatpush.bf16.msra.mxu3 %v3783_v8 }
 0x11f   :  { %2499 = vmatpush.bf16.msra.mxu1 %v3975_v54 }
 0x120   :  { %2458 = vmatmul.bf16.vlgmr.msra.gmra.mxu2 %v5233_v35  ;;  %2485 = vmatpush.bf16.msra.mxu0 %v3879_v55  ;;  %v2249_v35 = vpop.f32.mrf.mxu0 }
 0x121   :  { %2472 = vmatmul.bf16.vlgmr.msra.gmra.mxu3 %v5246_v44  ;;  %v2222_v44 = vadd.f32 %v2221_v59, %v2208_v1 }
 0x122   :  { %4038 = vmatmul.msk.bf16.vlgmr.msra.gmra.mxu1 %vm1988_vm1, %v5216_v27  ;;  %v2210_v27 = vadd.f32 %v2209_v0, %v2196_v6 }
 0x123   :  { %2486 = vmatmul.bf16.vlgmr.msra.gmra.mxu0 %v5235_v36  ;;  %v2263_v45 = vpop.f32.mrf.mxu1 }
 0x124   :  { %v2235_v4 = vpop.f32.mrf.mxu3  ;;  %v2224_v42 = vadd.f32 %v2223_v2, %v2210_v27 }
 0x125   :  { %v2236_v7 = vadd.f32 %v2235_v4, %v2222_v44 }
 0x127   :  { %v2277_v5 = vpop.f32.mrf.mxu2  ;;  %v2250_v36 = vadd.f32 %v2249_v35, %v2236_v7 }
 0x128   :  { %v2251_v9 = vpop.f32.mrf.mxu0 }
 0x129   :  { %v2264_v12 = vadd.f32 %v2263_v45, %v2250_v36 }
 0x12b   :  { %v2265_v14 = vpop.f32.mrf.mxu1  ;;  %v2278_v16 = vadd.f32 %v2277_v5, %v2264_v12 }
 0x12c   :  { %v2237_v10 = vpop.f32.mrf.mxu3 }
 0x12d   :  { %v2238_v13 = vadd.f32 %v2237_v10, %v2224_v42 }
 0x12f   :  { %v2279_v11 = vpop.f32.mrf.mxu2  ;;  %v2252_v17 = vadd.f32 %v2251_v9, %v2238_v13 }
 0x131   :  { %v2266_v61 = vadd.f32 %v2265_v14, %v2252_v17  ;;  %v4097_v17 = vld [vmem:[%s6561_s3 + $0x70] sm:$0xf] }
 0x133   :  { %v2280_v24 = vadd.f32 %v2279_v11, %v2266_v61  ;;  %v4099_v61 = vld [vmem:[%s6561_s3 + $0x78] sm:$0xf0] }
 0x140   :  { %v2305_v15 = vpop.f32.mrf.mxu0 }
 0x143   :  { %v2319_v19 = vpop.f32.mrf.mxu1  ;;  %v2333_v21 = vpop.f32.mrf.mxu2 }
 0x144   :  { %v2291_v18 = vpop.f32.mrf.mxu3 }
 0x145   :  { %v2292_v20 = vadd.f32 %v2291_v18, %v2278_v16  ;;  %v4463_v18 = vld [vmem:[%s6561_s3 + $0x74] sm:$0xf0] }
 0x147   :  { %v2306_v22 = vadd.f32 %v2305_v15, %v2292_v20 }
 0x148   :  { %v2307_v28 = vpop.f32.mrf.mxu0 }
 0x149   :  { %v2320_v23 = vadd.f32 %v2319_v19, %v2306_v22  ;;  %v4462_v19 = vld [vmem:[%s6561_s3 + $0x74] sm:$0xf]  ;;  %v4089_v22 = vld [vmem:[%s6561_s3 + $0x60] sm:$0xf] }
 0x14b   :  { %v6378_v25 = vadd.f32 %v2333_v21, %v2320_v23  ;;  %v2321_v29 = vpop.f32.mrf.mxu1  ;;  %v2335_v31 = vpop.f32.mrf.mxu2  ;;  %v4098_v21 = vor.u32 %v4463_v18, %v4097_v17  ;;  %v4461_v23 = vld [vmem:[%s6561_s3 + $0x64] sm:$0xf0] }
 0x14c   :  { %v2293_v26 = vpop.f32.mrf.mxu3 }
 0x14d   :  { %v2294_v62 = vadd.f32 %v2293_v26, %v2280_v24  ;;  %2510 = vrot.lane.b32.xlu1 %v6378_v25, %s4480_s1  ;;  %v4102_v26 = vor.u32 %v4462_v19, %v4099_v61  ;;  %2681 = vmatpush.bf16.msrb.mxu1 %v4098_v21  ;;  %v4466_v19 = vld [vmem:[%s6561_s3 + $0x94] sm:$0xf] }
 0x14f   :  { %v2308_v30 = vadd.f32 %v2307_v28, %v2294_v62  ;;  %v4460_v28 = vld [vmem:[%s6561_s3 + $0x64] sm:$0xf]  ;;  %v4091_v62 = vld [vmem:[%s6561_s3 + $0x68] sm:$0xf0]  ;;  %2709 = vmatpush.bf16.msrb.mxu3 %v4102_v26 }
 0x151   :  { %v2322_v32 = vadd.f32 %v2321_v29, %v2308_v30  ;;  %v4090_v29 = vor.u32 %v4461_v23, %v4089_v22  ;;  %v4094_v30 = vor.u32 %v4460_v28, %v4091_v62  ;;  %v4464_v22 = vld [vmem:[%s6561_s3 + $0x84] sm:$0xf]  ;;  %v4107_v23 = vld [vmem:[%s6561_s3 + $0x88] sm:$0xf0]  ;;  %v2529_v62 = vld [vmem:[%s6562_s2] sm:$0x3] }
 0x152   :  { %s4481_s2 = smov 2  }
 0x153   :  { %v6382_v33 = vadd.f32 %v2335_v31, %v2322_v32  ;;  %v4081_v31 = vld [vmem:[%s6561_s3 + $0x50] sm:$0xf]  ;;  %v4459_v32 = vld [vmem:[%s6561_s3 + $0x54] sm:$0xf0]  ;;  %2682 = vmatpush.bf16.msrb.mxu1 %v4090_v29  ;;  %2710 = vmatpush.bf16.msrb.mxu3 %v4094_v30  ;;  %v2532_v30 = vperm.slane %v2529_v62, 1 }
 0x155   :  { %2514 = vrot.lane.b32.xlu1 %v6382_v33, %s4480_s1 }
 0x160   :  { %v2375_v40 = vpop.f32.mrf.mxu0 }
 0x163   :  { %v2347_v34 = vpop.f32.mrf.mxu2  ;;  %v2389_v43 = vpop.f32.mrf.mxu1 }
 0x164   :  { %v2361_v39 = vpop.f32.mrf.mxu3 }
 0x165   :  { %v2362_v48 = vadd.f32 %v2361_v39, %v2347_v34  ;;  %v4458_v34 = vld [vmem:[%s6561_s3 + $0x54] sm:$0xf]  ;;  %v4083_v39 = vld [vmem:[%s6561_s3 + $0x58] sm:$0xf0] }
 0x167   :  { %v2376_v50 = vadd.f32 %v2375_v40, %v2362_v48  ;;  %v4082_v40 = vor.u32 %v4459_v32, %v4081_v31  ;;  %v4075_v48 = vld [vmem:[%s6561_s3 + $0x48] sm:$0xf0]  ;;  %v2531_v32 = vperm.slane %v2529_v62, 0 }
 0x168   :  { %v2377_v47 = vpop.f32.mrf.mxu0 }
 0x169   :  { %v2390_v8 = vadd.f32 %v2389_v43, %v2376_v50  ;;  %v4086_v43 = vor.u32 %v4458_v34, %v4083_v39  ;;  %2683 = vmatpush.bf16.msrb.mxu1 %v4082_v40 }
 0x16b   :  { %v2349_v52 = vpop.f32.mrf.mxu2  ;;  %v2391_v60 = vpop.f32.mrf.mxu1  ;;  %2711 = vmatpush.bf16.msrb.mxu3 %v4086_v43 }
 0x16c   :  { %v2363_v38 = vpop.f32.mrf.mxu3 }
 0x16d   :  { %v2364_v54 = vadd.f32 %v2363_v38, %v2349_v52  ;;  %v4073_v52 = vld [vmem:[%s6561_s3 + $0x40] sm:$0xf]  ;;  %v4457_v38 = vld [vmem:[%s6561_s3 + $0x44] sm:$0xf0] }
 0x16f   :  { %v2378_v57 = vadd.f32 %v2377_v47, %v2364_v54  ;;  %v4456_v47 = vld [vmem:[%s6561_s3 + $0x44] sm:$0xf] }
 0x170   :  { %v4078_v50 = vor.u32 %v4456_v47, %v4075_v48 }
 0x171   :  { %v2392_v41 = vadd.f32 %v2391_v60, %v2378_v57  ;;  %v4074_v60 = vor.u32 %v4457_v38, %v4073_v52 }
 0x172   :  { %2712 = vmatpush.bf16.msrb.mxu3 %v4078_v50 }
 0x173   :  { %2684 = vmatpush.bf16.msrb.mxu1 %v4074_v60 }
 0x180   :  { %v2431_v53 = vpop.f32.mrf.mxu0 }
 0x183   :  { %v2403_v49 = vpop.f32.mrf.mxu2  ;;  %v2445_v55 = vpop.f32.mrf.mxu1 }
 0x184   :  { %v2417_v51 = vpop.f32.mrf.mxu3  ;;  %v2404_v56 = vadd.f32 %v2403_v49, %v2390_v8  ;;  %v2565_v49 = vld [vmem:[%s6561_s3 + $0xa0] sm:$0xff]  ;;  %v4065_v8 = vld [vmem:[%s6561_s3 + $0x30] sm:$0xf] }
 0x185   :  { %v2628_v17 = vunpack.c.h.b16 %v2565_v49 }
 0x186   :  { %v2418_v58 = vadd.f32 %v2417_v51, %v2404_v56  ;;  %v4455_v51 = vld [vmem:[%s6561_s3 + $0x34] sm:$0xf0]  ;;  %v4067_v56 = vld [vmem:[%s6561_s3 + $0x38] sm:$0xf0] }
 0x187   :  { %v4066_v54 = vor.u32 %v4455_v51, %v4065_v8  ;;  %v2650_v18 = vpack.c.b16 %v2628_v17, %v2628_v17 }
 0x188   :  { %v2433_v0 = vpop.f32.mrf.mxu0  ;;  %v2432_v2 = vadd.f32 %v2431_v53, %v2418_v58  ;;  %v2627_v53 = vunpack.c.l.b16 %v2565_v49 }
 0x189   :  { %2685 = vmatpush.bf16.msrb.mxu1 %v4066_v54  ;;  %v2679_v21 = vsel %vm1992_vm0, %v2650_v18, 0 }
 0x18a   :  { %v2446_v35 = vadd.f32 %v2445_v55, %v2432_v2  ;;  %v4454_v55 = vld [vmem:[%s6561_s3 + $0x34] sm:$0xf]  ;;  %v2649_v58 = vpack.c.b16 %v2627_v53, %v2627_v53 }
 0x18b   :  { %v2405_v59 = vpop.f32.mrf.mxu2  ;;  %v2447_v1 = vpop.f32.mrf.mxu1  ;;  %v4070_v57 = vor.u32 %v4454_v55, %v4067_v56 }
 0x18c   :  { %v2419_v63 = vpop.f32.mrf.mxu3  ;;  %v2406_v37 = vadd.f32 %v2405_v59, %v2392_v41  ;;  %v4057_v59 = vld [vmem:[%s6561_s3 + $0x20] sm:$0xf]  ;;  %v4453_v41 = vld [vmem:[%s6561_s3 + $0x24] sm:$0xf0] }
 0x18d   :  { %2713 = vmatpush.bf16.msrb.mxu3 %v4070_v57  ;;  %v4058_v2 = vor.u32 %v4453_v41, %v4057_v59 }
 0x18e   :  { %v2420_v4 = vadd.f32 %v2419_v63, %v2406_v37  ;;  %v4452_v63 = vld [vmem:[%s6561_s3 + $0x24] sm:$0xf]  ;;  %v4113_v37 = vld [vmem:[%s6561_s3 + $0x90] sm:$0xf] }
 0x18f   :  { %2686 = vmatpush.bf16.msrb.mxu1 %v4058_v2 }
 0x190   :  { %v2434_v7 = vadd.f32 %v2433_v0, %v2420_v4  ;;  %v2676_v0 = vsel %vm1992_vm0, %v2649_v58, 0  ;;  %v4059_v4 = vld [vmem:[%s6561_s3 + $0x28] sm:$0xf0] }
 0x191   :  { %2700 = vmatpush.bf16.msrb.mxu0 %v2676_v0 }
 0x192   :  { %v2448_v10 = vadd.f32 %v2447_v1, %v2434_v7  ;;  %v4467_v1 = vld [vmem:[%s6561_s3 + $0x94] sm:$0xf0] }
 0x19f   :  { %v2501_v9 = vpop.f32.mrf.mxu1 }
 0x1a0   :  { %v2487_v6 = vpop.f32.mrf.mxu0 }
 0x1a3   :  { %v2459_v45 = vpop.f32.mrf.mxu2 }
 0x1a4   :  { %v2460_v44 = vadd.f32 %v2459_v45, %v2446_v35  ;;  %v2473_v5 = vpop.f32.mrf.mxu3  ;;  %v4114_v35 = vor.u32 %v4467_v1, %v4113_v37  ;;  %v4062_v45 = vor.u32 %v4452_v63, %v4059_v4  ;;  %v4151_v37 = vld [vmem:[%s6565_s5 + $0x38] sm:$0xf]  ;;  %v4475_v1 = vld [vmem:[%s6565_s5 + $0x38] sm:$0x70] }
 0x1a6   :  { %v2474_v27 = vadd.f32 %v2473_v5, %v2460_v44  ;;  %v4049_v44 = vld [vmem:[%s6561_s3 + $0x10] sm:$0xf]  ;;  %v4451_v5 = vld [vmem:[%s6561_s3 + $0x14] sm:$0xf0]  ;;  %2714 = vmatpush.bf16.msrb.mxu3 %v4062_v45  ;;  %2701 = vmatpush.bf16.msrb.mxu0 %v4114_v35  ;;  %v4152_v35 = vor.u32 %v4475_v1, %v4151_v37 }
 0x1a7   :  { %v2503_v20 = vpop.f32.mrf.mxu1  ;;  %v4050_v7 = vor.u32 %v4451_v5, %v4049_v44  ;;  %v4474_v45 = vld [vmem:[%s6565_s5 + $0x30] sm:$0xff]  ;;  %v4473_v44 = vld [vmem:[%s6565_s5 + $0x28] sm:$0xff]  ;;  %v4472_v5 = vld [vmem:[%s6565_s5 + $0x20] sm:$0xff] }
 0x1a8   :  { %v2488_v36 = vadd.f32 %v2487_v6, %v2474_v27  ;;  %v2489_v15 = vpop.f32.mrf.mxu0  ;;  %v4450_v6 = vld [vmem:[%s6561_s3 + $0x14] sm:$0xf]  ;;  %v4051_v27 = vld [vmem:[%s6561_s3 + $0x18] sm:$0xf0]  ;;  %v2838_v4 = vsel %vm2836_vm4, %v4152_v35, 0 }
 0x1a9   :  { %2687 = vmatpush.bf16.msrb.mxu1 %v4050_v7  ;;  %2840 = vmatpush.bf16.msrb.mxu2 %v2838_v4  ;;  %v4470_v7 = vld [vmem:[%s6565_s5 + $0x10] sm:$0xff] }
 0x1aa   :  { %v2502_v14 = vadd.f32 %v2501_v9, %v2488_v36  ;;  %v4054_v9 = vor.u32 %v4450_v6, %v4051_v27  ;;  %v4105_v36 = vld [vmem:[%s6561_s3 + $0x80] sm:$0xf]  ;;  %v4471_v6 = vld [vmem:[%s6565_s5 + $0x18] sm:$0xff]  ;;  %v4469_v27 = vld [vmem:[%s6565_s5 + $0x8] sm:$0xff] }
 0x1ab   :  { %v2461_v42 = vpop.f32.mrf.mxu2 }
 0x1ac   :  { %v2462_v11 = vadd.f32 %v2461_v42, %v2448_v10  ;;  %2512 = vrot.lane.b32.xlu0 %v2502_v14, %s4480_s1  ;;  %v2475_v12 = vpop.f32.mrf.mxu3  ;;  %v4465_v10 = vld [vmem:[%s6561_s3 + $0x84] sm:$0xf0]  ;;  %v4041_v42 = vld [vmem:[%s6561_s3] sm:$0xf]  ;;  %2715 = vmatpush.bf16.msrb.mxu3 %v4054_v9 }
 0x1ad   :  { %v4106_v14 = vor.u32 %v4465_v10, %v4105_v36  ;;  %2841 = vmatpush.bf16.msrb.mxu2 %v4474_v45  ;;  %v4468_v9 = vld [vmem:[%s6565_s5] sm:$0xff] }
 0x1ae   :  { %v2476_v13 = vadd.f32 %v2475_v12, %v2462_v11  ;;  %v4449_v11 = vld [vmem:[%s6561_s3 + $0x4] sm:$0xf0]  ;;  %v4448_v12 = vld [vmem:[%s6561_s3 + $0x4] sm:$0xf] }
 0x1af   :  { %2702 = vmatpush.bf16.msrb.mxu0 %v4106_v14 }
 0x1b0   :  { %v2490_v16 = vadd.f32 %v2489_v15, %v2476_v13  ;;  %v4042_v13 = vor.u32 %v4449_v11, %v4041_v42  ;;  %v4043_v15 = vld [vmem:[%s6561_s3 + $0x8] sm:$0xf0]  ;;  %v4478_v42 = vld [vmem:[%s6563_s4] ss:$0 sm:$0xff] }
 0x1b1   :  { %2842 = vmatpush.bf16.msrb.mxu2 %v4473_v44 }
 0x1b2   :  { %v2504_v24 = vadd.f32 %v2503_v20, %v2490_v16  ;;  %v4046_v16 = vor.u32 %v4448_v12, %v4043_v15  ;;  %2688 = vmatpush.bf16.msrb.mxu1 %v4042_v13  ;;  %v4115_v20 = vld [vmem:[%s6561_s3 + $0x98] sm:$0xf0] }
 0x1b3   :  { %2728 = vmatpush.bf16.msra.mxu0 %v2679_v21  ;;  %v4118_v61 = vor.u32 %v4466_v19, %v4115_v20 }
 0x1b4   :  { %2516 = vrot.lane.b32.xlu0 %v2504_v24, %s4480_s1  ;;  %2716 = vmatpush.bf16.msrb.mxu3 %v4046_v16  ;;  %v4110_v24 = vor.u32 %v4464_v22, %v4107_v23 }
 0x1b5   :  { %2843 = vmatpush.bf16.msrb.mxu2 %v4472_v5 }
 0x1b7   :  { %2729 = vmatpush.bf16.msra.mxu0 %v4118_v61  ;;  %v4479_v61 = vld [vmem:[%s6564_s6] ss:$0 sm:$0xff] }
 0x1b9   :  { %2844 = vmatpush.bf16.msrb.mxu2 %v4471_v6 }
 0x1bb   :  { %2730 = vmatpush.bf16.msra.mxu0 %v4110_v24 }
 0x1bd   :  { %2845 = vmatpush.bf16.msrb.mxu2 %v4470_v7 }
 0x1bf   :  { %v2511_v26 = vpop.permute.xlu1 %2510 }
 0x1c1   :  { %2846 = vmatpush.bf16.msrb.mxu2 %v4469_v27 }
 0x1c5   :  { %2847 = vmatpush.bf16.msrb.mxu2 %v4468_v9 }
 0x1c7   :  { %v2515_v39 = vpop.permute.xlu1 %2514 }
 0x21e   :  { %v2513_v28 = vpop.permute.xlu0 %2512 }
 0x21f   :  { %v2519_v29 = vsel %vm2518_vm2, %v2511_v26, %v2513_v28  ;;  %v2526_v31 = vmax.f32 %v6378_v25, %v2513_v28 }
 0x220   :  { %v2525_v34 = vmax.f32 %v6178_v3, %v2519_v29 }
 0x221   :  { %v2536_v43 = vadd.f32 %v2532_v30, %v2526_v31 }
 0x222   :  { %v2535_v47 = vadd.f32 %v2531_v32, %v2525_v34 }
 0x223   :  { %v2540_v49 = vmax.f32 %v2536_v43, 0.0 }
 0x224   :  { %v2539_v51 = vmax.f32 %v2535_v47, 0.0 }
 0x226   :  { %v2517_v40 = vpop.permute.xlu0 %2516 }
 0x227   :  { %v2520_v52 = vsel %vm2518_vm2, %v2515_v39, %v2517_v40  ;;  %v2528_v38 = vmax.f32 %v6382_v33, %v2517_v40 }
 0x228   :  { %v2527_v48 = vmax.f32 %v6235_v46, %v2520_v52 }
 0x229   :  { %v2538_v60 = vadd.f32 %v2532_v30, %v2528_v38 }
 0x22a   :  { %v2537_v50 = vadd.f32 %v2531_v32, %v2527_v48 }
 0x22b   :  { %v2542_v8 = vmax.f32 %v2538_v60, 0.0 }
 0x22c   :  { %v2541_v53 = vmax.f32 %v2537_v50, 0.0 }
 0x22d   :  { %v2544_v25 = vpack.c.bf16 %v2542_v8, %v2540_v49 }
 0x22e   :  { %v2543_v54 = vpack.c.bf16 %v2541_v53, %v2539_v51 }
 0x22f   :  { %4119 = vmatmul.msk.bf16.vlgmr.msrb.gmra.mxu0 %vm2671_vm3, %v2544_v25 }
 0x230   :  { %2689 = vmatmul.bf16.vlgmr.msrb.gmra.mxu1 %v2543_v54  ;;  %2717 = vmatmul.bf16.vlgmr.msrb.gmra.mxu3 %v2543_v54 }
 0x23f   :  { %4120 = vmatmul.msk.bf16.vlgmr.msra.gmra.mxu0 %vm2671_vm3, %v2544_v25 }
 0x2ac   :  { %v2704_v3 = vpop.f32.mrf.mxu0 }
 0x2ad   :  { %v2690_v55 = vpop.f32.mrf.mxu1 }
 0x2ae   :  { %v2705_v56 = vadd.f32 %v2704_v3, %v2690_v55 }
 0x2b0   :  { %2741 = vrot.lane.b32.xlu2 %v2705_v56, %s4481_s2 }
 0x2b3   :  { %v2718_v58 = vpop.f32.mrf.mxu3 }
 0x2b4   :  { %v2706_v33 = vpop.f32.mrf.mxu0 }
 0x2b5   :  { %v2692_v46 = vpop.f32.mrf.mxu1 }
 0x2b6   :  { %v2707_v57 = vadd.f32 %v2706_v33, %v2692_v46 }
 0x2b8   :  { %2745 = vrot.lane.b32.xlu0 %v2707_v57, %s4481_s2 }
 0x2bb   :  { %v2720_v63 = vpop.f32.mrf.mxu3 }
 0x2bc   :  { %v2732_v59 = vpop.f32.mrf.mxu0 }
 0x2bd   :  { %v2733_v41 = vadd.f32 %v2732_v59, %v2718_v58 }
 0x2bf   :  { %2743 = vrot.lane.b32.xlu2 %v2733_v41, %s4481_s2 }
 0x2c4   :  { %v2734_v0 = vpop.f32.mrf.mxu0 }
 0x2c5   :  { %v2735_v2 = vadd.f32 %v2734_v0, %v2720_v63 }
 0x2c7   :  { %2747 = vrot.lane.b32.xlu1 %v2735_v2, %s4481_s2 }
 0x30a   :  { %v2742_v36 = vpop.permute.xlu2 %2741 }
 0x319   :  { %v2744_v10 = vpop.permute.xlu2 %2743 }
 0x31a   :  { %v2750_v14 = vsel %vm2749_vm5, %v2742_v36, %v2744_v10 }
 0x31b   :  { %v2754_v11 = vmax.f32 %v2705_v56, %v2750_v14 }
 0x31d   :  { %v2760_v16 = vadd.f32 %v4478_v42, %v2754_v11 }
 0x31f   :  { %v2762_v19 = vmax.f32 %v2760_v16, 0.0 }
 0x32a   :  { %v2746_v12 = vpop.permute.xlu0 %2745 }
 0x339   :  { %v2748_v13 = vpop.permute.xlu1 %2747 }
 0x33a   :  { %v2751_v15 = vsel %vm2749_vm5, %v2746_v12, %v2748_v13 }
 0x33b   :  { %v2755_v17 = vmax.f32 %v2707_v57, %v2751_v15 }
 0x33d   :  { %v2761_v18 = vadd.f32 %v4478_v42, %v2755_v17 }
 0x33f   :  { %v2763_v20 = vmax.f32 %v2761_v18, 0.0 }
 0x341   :  { %v2764_v21 = vpack.c.bf16 %v2763_v20, %v2762_v19 }
 0x343   :  { %4153 = vmatmul.msk.bf16.vlgmr.msrb.gmra.mxu2 %vm2832_vm6, %v2764_v21 }
 0x3c6   :  { %v2849_v22 = vpop.f32.mrf.mxu2 }
 0x3c7   :  { %v2850_v23 = vadd.f32 %v4479_v61, %v2849_v22 }
 0x3c9   :  { %2854 = vst [vmem:[%s6566_s7] sm:$0xff] %v2850_v23 }
 0x3ce   :  { %v2851_v24 = vpop.f32.mrf.mxu2 }
 0x3cf   :  { %v2852_v26 = vadd.f32 %v4479_v61, %v2851_v24 }
 0x3d1   :  { %2855 = vst [vmem:[%s6566_s7 + $0x8] sm:$0xff] %v2852_v26 }

</bundles_post_ra>
